<compile_context>
chip_gen: v5e
topology: v5e:2x2
jax: 0.10.0
libtpu: 0.0.40
codegen_flags: <defaults>
</compile_context>

<pallas_src>
import functools
import math

import jax
import jax.numpy as jnp
from jax.experimental import pallas as pl
from jax.experimental.pallas import tpu as pltpu

# ----------------------------- small synthetic config -----------------------------
VOCAB = 50
MAX_POS = 16
HIDDEN = 64            # stands in for 768
HEADS = 4
HEAD_DIM = HIDDEN // HEADS
GROUPS = 4             # SqueezeBERT q/k/v/intermediate/output group count
INTERMEDIATE = 128
LAYERS = 2
NUM_CLASSES = 6        # "emotions"
LOGIT_PAD = 128        # lane-dense classifier output width (sliced to NUM_CLASSES outside)
LN_EPS = 1e-12


# ----------------------------- in-kernel helpers -----------------------------
def _layernorm(y, g, b, eps):
    mu = jnp.mean(y, axis=-1, keepdims=True)
    var = jnp.mean((y - mu) * (y - mu), axis=-1, keepdims=True)
    return (y - mu) * jax.lax.rsqrt(var + eps) * g + b


# ----------------------------- fused encoder kernel -----------------------------
def encoder_kernel(
    # inputs
    mask_ref, xemb_ref, embg_ref, embb_ref,
    qkvw_ref, qkvb_ref, ow_ref, ob_ref, ln1g_ref, ln1b_ref,
    iw_ref, ib_ref, fw_ref, fb_ref, ln2g_ref, ln2b_ref,
    poolw_ref, poolb_ref, outw_ref, outb_ref,
    # outputs
    logits_ref,
    # scratch
    x_sc, ctx_sc,
    *, batch, seq, hidden, heads, head_dim, eps):
    layer = pl.program_id(0)
    n_layers = pl.num_programs(0)

    # Layer 0: embedding LayerNorm straight into the VMEM-resident residual stream.
    @pl.when(layer == 0)
    def _():
        x_sc[...] = _layernorm(xemb_ref[...], embg_ref[...], embb_ref[...], eps)

    x = x_sc[...]                                   # [M, H] f32 residual stream
    x_bf = x.astype(jnp.bfloat16)

    # Fused grouped QKV projection: block-diagonal dense == grouped Conv1d(k=1); one MXU dot.
    qkv = jnp.dot(x_bf, qkvw_ref[...], preferred_element_type=jnp.float32) + qkvb_ref[...]
    q = qkv[:, :hidden].astype(jnp.bfloat16)
    k = qkv[:, hidden:2 * hidden].astype(jnp.bfloat16)
    v = qkv[:, 2 * hidden:3 * hidden].astype(jnp.bfloat16)

    # Additive attention-mask bias built in-kernel from the [B, S] mask.
    neg_bias = (1.0 - mask_ref[...]) * -1e9         # [B, S]

    scale = 1.0 / math.sqrt(head_dim)
    # Multi-head attention: static unrolled (batch, head) loops, per-head context written
    # directly into its output slice (no concat).
    for b in range(batch):
        rows = slice(b * seq, (b + 1) * seq)
        bias_b = neg_bias[b:b + 1, :]               # [1, S] broadcasts over query rows
        for h in range(heads):
            cols = slice(h * head_dim, (h + 1) * head_dim)
            qh = q[rows, cols]
            kh = k[rows, cols]
            vh = v[rows, cols]
            s = jnp.dot(qh, kh.T, preferred_element_type=jnp.float32) * scale + bias_b
            s = s - jnp.max(s, axis=-1, keepdims=True)
            p = jnp.exp(s)
            p = p * pl.reciprocal(jnp.sum(p, axis=-1, keepdims=True), approx=True)
            ctx_sc[rows, cols] = jnp.dot(p.astype(jnp.bfloat16), vh,
                                         preferred_element_type=jnp.float32)

    ctx = ctx_sc[...].astype(jnp.bfloat16)
    attn_out = jnp.dot(ctx, ow_ref[...], preferred_element_type=jnp.float32) + ob_ref[...]
    # TODO(synk): internal SqueezeBERT dropouts are identity at inference and are omitted.
    x = _layernorm(attn_out + x, ln1g_ref[...], ln1b_ref[...], eps)

    ffn = jnp.dot(x.astype(jnp.bfloat16), iw_ref[...],
                  preferred_element_type=jnp.float32) + ib_ref[...]
    # TODO(synk): HF SqueezeBERT uses exact erf GELU; tanh approximation used here.
    ffn = jax.nn.gelu(ffn, approximate=True)
    ffn = jnp.dot(ffn.astype(jnp.bfloat16), fw_ref[...],
                  preferred_element_type=jnp.float32) + fb_ref[...]
    x = _layernorm(ffn + x, ln2g_ref[...], ln2b_ref[...], eps)

    x_sc[...] = x                                   # carry residual to next layer in VMEM

    # Final layer: tanh pooler on token 0 + (dropout == identity at eval) + linear head.
    @pl.when(layer == n_layers - 1)
    def _():
        # TODO(synk): nn.Dropout(0.3) is identity at inference; stochastic mask not applied.
        for bb in range(batch):
            h0 = x[bb * seq:bb * seq + 1, :]        # [1, H] token 0 of sample bb
            pooled = jnp.tanh(
                jnp.dot(h0.astype(jnp.bfloat16), poolw_ref[...],
                        preferred_element_type=jnp.float32) + poolb_ref[...])
            logits_ref[bb:bb + 1, :] = (
                jnp.dot(pooled.astype(jnp.bfloat16), outw_ref[...],
                        preferred_element_type=jnp.float32) + outb_ref[...])


# ----------------------------- parameters -----------------------------
def init_params(key):
    def nrm(k, shape):
        return (0.02 * jax.random.normal(k, shape)).astype(jnp.float32)

    def block_diag(w):  # [G, a, b] -> block-diagonal [G*a, G*b]  (== grouped conv1d k=1)
        return jax.scipy.linalg.block_diag(*[w[g] for g in range(w.shape[0])])

    gh = HIDDEN // GROUPS
    gi = INTERMEDIATE // GROUPS
    keys = iter(jax.random.split(key, 32))

    qkv_w, qkv_b, o_w, o_b = [], [], [], []
    ln1_g, ln1_b, i_w, i_b, f_w, f_b, ln2_g, ln2_b = [], [], [], [], [], [], [], []
    for _ in range(LAYERS):
        qw = block_diag(nrm(next(keys), (GROUPS, gh, gh)))
        kw = block_diag(nrm(next(keys), (GROUPS, gh, gh)))
        vw = block_diag(nrm(next(keys), (GROUPS, gh, gh)))
        qkv_w.append(jnp.concatenate([qw, kw, vw], axis=1))        # [H, 3H]
        qkv_b.append(jnp.zeros((1, 3 * HIDDEN), jnp.float32))
        o_w.append(nrm(next(keys), (HIDDEN, HIDDEN)))              # post-attn conv, groups=1
        o_b.append(jnp.zeros((1, HIDDEN), jnp.float32))
        ln1_g.append(jnp.ones((1, HIDDEN), jnp.float32))
        ln1_b.append(jnp.zeros((1, HIDDEN), jnp.float32))
        i_w.append(block_diag(nrm(next(keys), (GROUPS, gh, gi))))  # [H, I]
        i_b.append(jnp.zeros((1, INTERMEDIATE), jnp.float32))
        f_w.append(block_diag(nrm(next(keys), (GROUPS, gi, gh))))  # [I, H]
        f_b.append(jnp.zeros((1, HIDDEN), jnp.float32))
        ln2_g.append(jnp.ones((1, HIDDEN), jnp.float32))
        ln2_b.append(jnp.zeros((1, HIDDEN), jnp.float32))

    out_w_real = nrm(next(keys), (HIDDEN, NUM_CLASSES))
    out_w_pad = jnp.zeros((HIDDEN, LOGIT_PAD), jnp.float32).at[:, :NUM_CLASSES].set(out_w_real)

    p = {
        "word_emb": nrm(next(keys), (VOCAB, HIDDEN)),
        "pos_emb": nrm(next(keys), (MAX_POS, HIDDEN)),
        "type_emb": nrm(next(keys), (2, HIDDEN)),
        "emb_ln_g": jnp.ones((1, HIDDEN), jnp.float32),
        "emb_ln_b": jnp.zeros((1, HIDDEN), jnp.float32),
        # stacked per-layer weights; matmul operands stored as bf16 (f32 accumulation in-kernel)
        "qkv_w": jnp.stack(qkv_w).astype(jnp.bfloat16),   # [L, H, 3H]
        "qkv_b": jnp.stack(qkv_b),                        # [L, 1, 3H]
        "o_w": jnp.stack(o_w).astype(jnp.bfloat16),       # [L, H, H]
        "o_b": jnp.stack(o_b),                            # [L, 1, H]
        "ln1_g": jnp.stack(ln1_g), "ln1_b": jnp.stack(ln1_b),
        "i_w": jnp.stack(i_w).astype(jnp.bfloat16),       # [L, H, I]
        "i_b": jnp.stack(i_b),                            # [L, 1, I]
        "f_w": jnp.stack(f_w).astype(jnp.bfloat16),       # [L, I, H]
        "f_b": jnp.stack(f_b),                            # [L, 1, H]
        "ln2_g": jnp.stack(ln2_g), "ln2_b": jnp.stack(ln2_b),
        "pool_w": nrm(next(keys), (HIDDEN, HIDDEN)).astype(jnp.bfloat16),
        "pool_b": jnp.zeros((1, HIDDEN), jnp.float32),
        "out_w": out_w_pad.astype(jnp.bfloat16),          # [H, 128] lane-padded
        "out_b": jnp.zeros((1, LOGIT_PAD), jnp.float32),
    }
    return p


# ----------------------------- forward -----------------------------
@jax.jit
def emotion_classifier_forward(params, ids, mask):
    b, s = ids.shape
    m = b * s

    # Embedding lookup + positional/type add (plain JAX gather glue).
    emb = (
        jnp.take(params["word_emb"], ids, axis=0)
        + params["pos_emb"][:s][None, :, :]
        + params["type_emb"][0][None, None, :]
    ).astype(jnp.float32)
    x_emb = emb.reshape(m, HIDDEN)
    mask_f = mask.astype(jnp.float32)               # [B, S]

    def const_spec(shape):
        n = len(shape)
        return pl.BlockSpec(shape, lambda l, n=n: (0,) * n)

    def layer_spec(tail):
        n = len(tail)
        return pl.BlockSpec((None,) + tail, lambda l, n=n: (l,) + (0,) * n)

    in_specs = [
        const_spec((b, s)),                   # mask
        const_spec((m, HIDDEN)),              # embeddings (pre-LN)
        const_spec((1, HIDDEN)),              # emb_ln_g
        const_spec((1, HIDDEN)),              # emb_ln_b
        layer_spec((HIDDEN, 3 * HIDDEN)),     # qkv_w
        layer_spec((1, 3 * HIDDEN)),          # qkv_b
        layer_spec((HIDDEN, HIDDEN)),         # o_w
        layer_spec((1, HIDDEN)),              # o_b
        layer_spec((1, HIDDEN)),              # ln1_g
        layer_spec((1, HIDDEN)),              # ln1_b
        layer_spec((HIDDEN, INTERMEDIATE)),   # i_w
        layer_spec((1, INTERMEDIATE)),        # i_b
        layer_spec((INTERMEDIATE, HIDDEN)),   # f_w
        layer_spec((1, HIDDEN)),              # f_b
        layer_spec((1, HIDDEN)),              # ln2_g
        layer_spec((1, HIDDEN)),              # ln2_b
        const_spec((HIDDEN, HIDDEN)),         # pool_w
        const_spec((1, HIDDEN)),              # pool_b
        const_spec((HIDDEN, LOGIT_PAD)),      # out_w (lane padded)
        const_spec((1, LOGIT_PAD)),           # out_b (lane padded)
    ]

    kern = functools.partial(
        encoder_kernel, batch=b, seq=s, hidden=HIDDEN,
        heads=HEADS, head_dim=HEAD_DIM, eps=LN_EPS)

    logits_pad = pl.pallas_call(
        kern,
        grid=(LAYERS,),
        in_specs=in_specs,
        out_specs=pl.BlockSpec((b, LOGIT_PAD), lambda l: (0, 0)),
        out_shape=jax.ShapeDtypeStruct((b, LOGIT_PAD), jnp.float32),
        scratch_shapes=[
            pltpu.VMEM((m, HIDDEN), jnp.float32),   # residual stream, persists across layers
            pltpu.VMEM((m, HIDDEN), jnp.float32),   # attention context assembly
        ],
        compiler_params=pltpu.CompilerParams(dimension_semantics=("arbitrary",)),
    )(
        mask_f, x_emb, params["emb_ln_g"], params["emb_ln_b"],
        params["qkv_w"], params["qkv_b"], params["o_w"], params["o_b"],
        params["ln1_g"], params["ln1_b"], params["i_w"], params["i_b"],
        params["f_w"], params["f_b"], params["ln2_g"], params["ln2_b"],
        params["pool_w"], params["pool_b"], params["out_w"], params["out_b"],
    )

    return logits_pad[:, :NUM_CLASSES]


# ----------------------------- main -----------------------------
if __name__ == "__main__":
    key = jax.random.PRNGKey(0)
    pkey, ikey = jax.random.split(key)
    params = init_params(pkey)

    B, S = 2, 8
    ids = jax.random.randint(ikey, (B, S), 0, VOCAB, dtype=jnp.int32)
    mask = jnp.ones((B, S), jnp.int32).at[1, S - 2:].set(0)   # pad last 2 tokens of sample 1

    logits = emotion_classifier_forward(params, ids, mask)
    logits = jax.block_until_ready(logits)
    assert logits.shape == (B, NUM_CLASSES) and logits.dtype == jnp.float32
    assert bool(jnp.all(jnp.isfinite(logits)))
    print("KERNEL_OK")
</pallas_src>

<mosaic_0001>
module attributes {stable_mosaic.version = 11 : i64} {
  func.func @encoder_kernel(%arg0: i32, %arg1: memref<2x8xf32, #tpu.memory_space<vmem>>, %arg2: memref<16x64xf32, #tpu.memory_space<vmem>>, %arg3: memref<1x64xf32, #tpu.memory_space<vmem>>, %arg4: memref<1x64xf32, #tpu.memory_space<vmem>>, %arg5: memref<1x64x192xbf16, #tpu.memory_space<vmem>>, %arg6: memref<1x1x192xf32, #tpu.memory_space<vmem>>, %arg7: memref<1x64x64xbf16, #tpu.memory_space<vmem>>, %arg8: memref<1x1x64xf32, #tpu.memory_space<vmem>>, %arg9: memref<1x1x64xf32, #tpu.memory_space<vmem>>, %arg10: memref<1x1x64xf32, #tpu.memory_space<vmem>>, %arg11: memref<1x64x128xbf16, #tpu.memory_space<vmem>>, %arg12: memref<1x1x128xf32, #tpu.memory_space<vmem>>, %arg13: memref<1x128x64xbf16, #tpu.memory_space<vmem>>, %arg14: memref<1x1x64xf32, #tpu.memory_space<vmem>>, %arg15: memref<1x1x64xf32, #tpu.memory_space<vmem>>, %arg16: memref<1x1x64xf32, #tpu.memory_space<vmem>>, %arg17: memref<64x64xbf16, #tpu.memory_space<vmem>>, %arg18: memref<1x64xf32, #tpu.memory_space<vmem>>, %arg19: memref<64x128xbf16, #tpu.memory_space<vmem>>, %arg20: memref<1x128xf32, #tpu.memory_space<vmem>>, %arg21: memref<2x128xf32, #tpu.memory_space<vmem>>, %arg22: memref<16x64xf32, #tpu.memory_space<vmem>>, %arg23: memref<16x64xf32, #tpu.memory_space<vmem>>) attributes {dimension_semantics = [#tpu.dimension_semantics<arbitrary>], iteration_bounds = array<i64: 2>, scalar_prefetch = 0 : i64, scratch_operands = 2 : i64, tpu.core_type = #tpu.core_type<tc>, window_params = [{pipeline_mode = #tpu.pipeline_mode<synchronous>, transform_indices = @transform_0, window_bounds = array<i64: 2, 8>}, {pipeline_mode = #tpu.pipeline_mode<synchronous>, transform_indices = @transform_1, window_bounds = array<i64: 16, 64>}, {pipeline_mode = #tpu.pipeline_mode<synchronous>, transform_indices = @transform_2, window_bounds = array<i64: 1, 64>}, {pipeline_mode = #tpu.pipeline_mode<synchronous>, transform_indices = @transform_3, window_bounds = array<i64: 1, 64>}, {transform_indices = @transform_4, window_bounds = array<i64: 1, 64, 192>}, {transform_indices = @transform_5, window_bounds = array<i64: 1, 1, 192>}, {transform_indices = @transform_6, window_bounds = array<i64: 1, 64, 64>}, {transform_indices = @transform_7, window_bounds = array<i64: 1, 1, 64>}, {transform_indices = @transform_8, window_bounds = array<i64: 1, 1, 64>}, {transform_indices = @transform_9, window_bounds = array<i64: 1, 1, 64>}, {transform_indices = @transform_10, window_bounds = array<i64: 1, 64, 128>}, {transform_indices = @transform_11, window_bounds = array<i64: 1, 1, 128>}, {transform_indices = @transform_12, window_bounds = array<i64: 1, 128, 64>}, {transform_indices = @transform_13, window_bounds = array<i64: 1, 1, 64>}, {transform_indices = @transform_14, window_bounds = array<i64: 1, 1, 64>}, {transform_indices = @transform_15, window_bounds = array<i64: 1, 1, 64>}, {pipeline_mode = #tpu.pipeline_mode<synchronous>, transform_indices = @transform_16, window_bounds = array<i64: 64, 64>}, {pipeline_mode = #tpu.pipeline_mode<synchronous>, transform_indices = @transform_17, window_bounds = array<i64: 1, 64>}, {pipeline_mode = #tpu.pipeline_mode<synchronous>, transform_indices = @transform_18, window_bounds = array<i64: 64, 128>}, {pipeline_mode = #tpu.pipeline_mode<synchronous>, transform_indices = @transform_19, window_bounds = array<i64: 1, 128>}, {pipeline_mode = #tpu.pipeline_mode<synchronous>, transform_indices = @transform_20, window_bounds = array<i64: 2, 128>}]} {
    %c0_i32 = arith.constant 0 : i32
    %0 = arith.cmpi eq, %arg0, %c0_i32 : i32
    %1 = arith.extui %0 : i1 to i32
    %c0_i32_0 = arith.constant 0 : i32
    %2 = arith.cmpi ne, %1, %c0_i32_0 : i32
    scf.if %2 {
      %c0_116 = arith.constant 0 : index
      %c0_117 = arith.constant 0 : index
      %301 = vector.load %arg2[%c0_116, %c0_117] : memref<16x64xf32, #tpu.memory_space<vmem>>, vector<16x64xf32>
      %c0_118 = arith.constant 0 : index
      %c0_119 = arith.constant 0 : index
      %302 = vector.load %arg3[%c0_118, %c0_119] : memref<1x64xf32, #tpu.memory_space<vmem>>, vector<1x64xf32>
      %c0_120 = arith.constant 0 : index
      %c0_121 = arith.constant 0 : index
      %303 = vector.load %arg4[%c0_120, %c0_121] : memref<1x64xf32, #tpu.memory_space<vmem>>, vector<1x64xf32>
      %cst_122 = arith.constant dense<0.000000e+00> : vector<16xf32>
      %304 = vector.multi_reduction <add>, %301, %cst_122 [1] : vector<16x64xf32> to vector<16xf32>
      %305 = vector.shape_cast %304 : vector<16xf32> to vector<16x1xf32>
      %cst_123 = arith.constant 6.400000e+01 : f32
      %306 = vector.broadcast %cst_123 : f32 to vector<16x1xf32>
      %307 = arith.divf %305, %306 : vector<16x1xf32>
      %308 = vector.broadcast %307 : vector<16x1xf32> to vector<16x64xf32>
      %309 = arith.subf %301, %308 : vector<16x64xf32>
      %310 = vector.broadcast %307 : vector<16x1xf32> to vector<16x64xf32>
      %311 = arith.subf %301, %310 : vector<16x64xf32>
      %312 = arith.mulf %309, %311 : vector<16x64xf32>
      %cst_124 = arith.constant dense<0.000000e+00> : vector<16xf32>
      %313 = vector.multi_reduction <add>, %312, %cst_124 [1] : vector<16x64xf32> to vector<16xf32>
      %314 = vector.shape_cast %313 : vector<16xf32> to vector<16x1xf32>
      %cst_125 = arith.constant 6.400000e+01 : f32
      %315 = vector.broadcast %cst_125 : f32 to vector<16x1xf32>
      %316 = arith.divf %314, %315 : vector<16x1xf32>
      %317 = vector.broadcast %307 : vector<16x1xf32> to vector<16x64xf32>
      %318 = arith.subf %301, %317 : vector<16x64xf32>
      %cst_126 = arith.constant 9.99999996E-13 : f32
      %319 = vector.broadcast %cst_126 : f32 to vector<16x1xf32>
      %320 = arith.addf %316, %319 : vector<16x1xf32>
      %321 = math.rsqrt %320 : vector<16x1xf32>
      %322 = vector.broadcast %321 : vector<16x1xf32> to vector<16x64xf32>
      %323 = arith.mulf %318, %322 : vector<16x64xf32>
      %324 = vector.broadcast %302 : vector<1x64xf32> to vector<16x64xf32>
      %325 = arith.mulf %323, %324 : vector<16x64xf32>
      %326 = vector.broadcast %303 : vector<1x64xf32> to vector<16x64xf32>
      %327 = arith.addf %325, %326 : vector<16x64xf32>
      %c0_127 = arith.constant 0 : index
      %c0_128 = arith.constant 0 : index
      %328 = vector.load %arg22[%c0_127, %c0_128] : memref<16x64xf32, #tpu.memory_space<vmem>>, vector<16x64xf32>
      tpu.vector_store %arg22[%c0_127, %c0_128], %327 {strides = array<i32>} : memref<16x64xf32, #tpu.memory_space<vmem>>, vector<16x64xf32>,
    } else {
    }
    %c0 = arith.constant 0 : index
    %c0_1 = arith.constant 0 : index
    %3 = vector.load %arg22[%c0, %c0_1] : memref<16x64xf32, #tpu.memory_space<vmem>>, vector<16x64xf32>
    %4 = arith.truncf %3 : vector<16x64xf32> to vector<16x64xbf16>
    %c0_2 = arith.constant 0 : index
    %c0_3 = arith.constant 0 : index
    %c0_4 = arith.constant 0 : index
    %5 = vector.load %arg5[%c0_2, %c0_3, %c0_4] : memref<1x64x192xbf16, #tpu.memory_space<vmem>>, vector<1x64x192xbf16>
    %6 = vector.shape_cast %5 : vector<1x64x192xbf16> to vector<64x192xbf16>
    %cst = arith.constant dense<0.000000e+00> : vector<16x192xf32>
    %7 = tpu.matmul %4, %6, %cst {dimension_numbers = #tpu.dot_dimension_numbers<[1], [0], [0], [1], [0, 0, 1, 1], [], []>} : vector<16x64xbf16>, vector<64x192xbf16>, vector<16x192xf32> -> vector<16x192xf32>
    %c0_5 = arith.constant 0 : index
    %c0_6 = arith.constant 0 : index
    %c0_7 = arith.constant 0 : index
    %8 = vector.load %arg6[%c0_5, %c0_6, %c0_7] : memref<1x1x192xf32, #tpu.memory_space<vmem>>, vector<1x1x192xf32>
    %9 = vector.shape_cast %8 : vector<1x1x192xf32> to vector<1x192xf32>
    %10 = vector.broadcast %9 : vector<1x192xf32> to vector<16x192xf32>
    %11 = arith.addf %7, %10 : vector<16x192xf32>
    %12 = vector.extract_strided_slice %11 {offsets = [0, 0], sizes = [16, 64], strides = [1, 1]} : vector<16x192xf32> to vector<16x64xf32>
    %13 = arith.truncf %12 : vector<16x64xf32> to vector<16x64xbf16>
    %14 = vector.extract_strided_slice %11 {offsets = [0, 64], sizes = [16, 64], strides = [1, 1]} : vector<16x192xf32> to vector<16x64xf32>
    %15 = arith.truncf %14 : vector<16x64xf32> to vector<16x64xbf16>
    %16 = vector.extract_strided_slice %11 {offsets = [0, 128], sizes = [16, 64], strides = [1, 1]} : vector<16x192xf32> to vector<16x64xf32>
    %17 = arith.truncf %16 : vector<16x64xf32> to vector<16x64xbf16>
    %c0_8 = arith.constant 0 : index
    %c0_9 = arith.constant 0 : index
    %18 = vector.load %arg1[%c0_8, %c0_9] : memref<2x8xf32, #tpu.memory_space<vmem>>, vector<2x8xf32>
    %cst_10 = arith.constant 1.000000e+00 : f32
    %19 = vector.broadcast %cst_10 : f32 to vector<2x8xf32>
    %20 = arith.subf %19, %18 : vector<2x8xf32>
    %cst_11 = arith.constant -1.000000e+09 : f32
    %21 = vector.broadcast %cst_11 : f32 to vector<2x8xf32>
    %22 = arith.mulf %20, %21 : vector<2x8xf32>
    %23 = vector.extract_strided_slice %22 {offsets = [0, 0], sizes = [1, 8], strides = [1, 1]} : vector<2x8xf32> to vector<1x8xf32>
    %24 = vector.extract_strided_slice %13 {offsets = [0, 0], sizes = [8, 16], strides = [1, 1]} : vector<16x64xbf16> to vector<8x16xbf16>
    %25 = vector.extract_strided_slice %15 {offsets = [0, 0], sizes = [8, 16], strides = [1, 1]} : vector<16x64xbf16> to vector<8x16xbf16>
    %26 = vector.extract_strided_slice %17 {offsets = [0, 0], sizes = [8, 16], strides = [1, 1]} : vector<16x64xbf16> to vector<8x16xbf16>
    %27 = tpu.transpose %25, [1, 0] : vector<8x16xbf16> -> vector<16x8xbf16>
    %cst_12 = arith.constant dense<0.000000e+00> : vector<8x8xf32>
    %28 = tpu.matmul %24, %27, %cst_12 {dimension_numbers = #tpu.dot_dimension_numbers<[1], [0], [0], [1], [0, 0, 1, 1], [], []>} : vector<8x16xbf16>, vector<16x8xbf16>, vector<8x8xf32> -> vector<8x8xf32>
    %cst_13 = arith.constant 2.500000e-01 : f32
    %29 = vector.broadcast %cst_13 : f32 to vector<8x8xf32>
    %30 = arith.mulf %28, %29 : vector<8x8xf32>
    %31 = vector.broadcast %23 : vector<1x8xf32> to vector<8x8xf32>
    %32 = arith.addf %30, %31 : vector<8x8xf32>
    %cst_14 = arith.constant dense<0xFF800000> : vector<8xf32>
    %33 = vector.multi_reduction <maximumf>, %32, %cst_14 [1] : vector<8x8xf32> to vector<8xf32>
    %34 = vector.shape_cast %33 : vector<8xf32> to vector<8x1xf32>
    %35 = vector.broadcast %34 : vector<8x1xf32> to vector<8x8xf32>
    %36 = arith.subf %32, %35 : vector<8x8xf32>
    %37 = math.exp %36 : vector<8x8xf32>
    %cst_15 = arith.constant dense<0.000000e+00> : vector<8xf32>
    %38 = vector.multi_reduction <add>, %37, %cst_15 [1] : vector<8x8xf32> to vector<8xf32>
    %39 = vector.shape_cast %38 : vector<8xf32> to vector<8x1xf32>
    %40 = tpu.reciprocal %39 {approx = true} : vector<8x1xf32> -> vector<8x1xf32>
    %41 = vector.broadcast %40 : vector<8x1xf32> to vector<8x8xf32>
    %42 = arith.mulf %37, %41 : vector<8x8xf32>
    %43 = arith.truncf %42 : vector<8x8xf32> to vector<8x8xbf16>
    %cst_16 = arith.constant dense<0.000000e+00> : vector<8x16xf32>
    %44 = tpu.matmul %43, %26, %cst_16 {dimension_numbers = #tpu.dot_dimension_numbers<[1], [0], [0], [1], [0, 0, 1, 1], [], []>} : vector<8x8xbf16>, vector<8x16xbf16>, vector<8x16xf32> -> vector<8x16xf32>
    %c0_17 = arith.constant 0 : index
    %c0_18 = arith.constant 0 : index
    %45 = vector.load %arg23[%c0_17, %c0_18] : memref<16x64xf32, #tpu.memory_space<vmem>>, vector<8x16xf32>
    tpu.vector_store %arg23[%c0_17, %c0_18], %44 {strides = array<i32>} : memref<16x64xf32, #tpu.memory_space<vmem>>, vector<8x16xf32>,
    %46 = vector.extract_strided_slice %13 {offsets = [0, 16], sizes = [8, 16], strides = [1, 1]} : vector<16x64xbf16> to vector<8x16xbf16>
    %47 = vector.extract_strided_slice %15 {offsets = [0, 16], sizes = [8, 16], strides = [1, 1]} : vector<16x64xbf16> to vector<8x16xbf16>
    %48 = vector.extract_strided_slice %17 {offsets = [0, 16], sizes = [8, 16], strides = [1, 1]} : vector<16x64xbf16> to vector<8x16xbf16>
    %49 = tpu.transpose %47, [1, 0] : vector<8x16xbf16> -> vector<16x8xbf16>
    %cst_19 = arith.constant dense<0.000000e+00> : vector<8x8xf32>
    %50 = tpu.matmul %46, %49, %cst_19 {dimension_numbers = #tpu.dot_dimension_numbers<[1], [0], [0], [1], [0, 0, 1, 1], [], []>} : vector<8x16xbf16>, vector<16x8xbf16>, vector<8x8xf32> -> vector<8x8xf32>
    %cst_20 = arith.constant 2.500000e-01 : f32
    %51 = vector.broadcast %cst_20 : f32 to vector<8x8xf32>
    %52 = arith.mulf %50, %51 : vector<8x8xf32>
    %53 = vector.broadcast %23 : vector<1x8xf32> to vector<8x8xf32>
    %54 = arith.addf %52, %53 : vector<8x8xf32>
    %cst_21 = arith.constant dense<0xFF800000> : vector<8xf32>
    %55 = vector.multi_reduction <maximumf>, %54, %cst_21 [1] : vector<8x8xf32> to vector<8xf32>
    %56 = vector.shape_cast %55 : vector<8xf32> to vector<8x1xf32>
    %57 = vector.broadcast %56 : vector<8x1xf32> to vector<8x8xf32>
    %58 = arith.subf %54, %57 : vector<8x8xf32>
    %59 = math.exp %58 : vector<8x8xf32>
    %cst_22 = arith.constant dense<0.000000e+00> : vector<8xf32>
    %60 = vector.multi_reduction <add>, %59, %cst_22 [1] : vector<8x8xf32> to vector<8xf32>
    %61 = vector.shape_cast %60 : vector<8xf32> to vector<8x1xf32>
    %62 = tpu.reciprocal %61 {approx = true} : vector<8x1xf32> -> vector<8x1xf32>
    %63 = vector.broadcast %62 : vector<8x1xf32> to vector<8x8xf32>
    %64 = arith.mulf %59, %63 : vector<8x8xf32>
    %65 = arith.truncf %64 : vector<8x8xf32> to vector<8x8xbf16>
    %cst_23 = arith.constant dense<0.000000e+00> : vector<8x16xf32>
    %66 = tpu.matmul %65, %48, %cst_23 {dimension_numbers = #tpu.dot_dimension_numbers<[1], [0], [0], [1], [0, 0, 1, 1], [], []>} : vector<8x8xbf16>, vector<8x16xbf16>, vector<8x16xf32> -> vector<8x16xf32>
    %c0_24 = arith.constant 0 : index
    %c16 = arith.constant 16 : index
    %67 = vector.load %arg23[%c0_24, %c16] : memref<16x64xf32, #tpu.memory_space<vmem>>, vector<8x16xf32>
    tpu.vector_store %arg23[%c0_24, %c16], %66 {strides = array<i32>} : memref<16x64xf32, #tpu.memory_space<vmem>>, vector<8x16xf32>,
    %68 = vector.extract_strided_slice %13 {offsets = [0, 32], sizes = [8, 16], strides = [1, 1]} : vector<16x64xbf16> to vector<8x16xbf16>
    %69 = vector.extract_strided_slice %15 {offsets = [0, 32], sizes = [8, 16], strides = [1, 1]} : vector<16x64xbf16> to vector<8x16xbf16>
    %70 = vector.extract_strided_slice %17 {offsets = [0, 32], sizes = [8, 16], strides = [1, 1]} : vector<16x64xbf16> to vector<8x16xbf16>
    %71 = tpu.transpose %69, [1, 0] : vector<8x16xbf16> -> vector<16x8xbf16>
    %cst_25 = arith.constant dense<0.000000e+00> : vector<8x8xf32>
    %72 = tpu.matmul %68, %71, %cst_25 {dimension_numbers = #tpu.dot_dimension_numbers<[1], [0], [0], [1], [0, 0, 1, 1], [], []>} : vector<8x16xbf16>, vector<16x8xbf16>, vector<8x8xf32> -> vector<8x8xf32>
    %cst_26 = arith.constant 2.500000e-01 : f32
    %73 = vector.broadcast %cst_26 : f32 to vector<8x8xf32>
    %74 = arith.mulf %72, %73 : vector<8x8xf32>
    %75 = vector.broadcast %23 : vector<1x8xf32> to vector<8x8xf32>
    %76 = arith.addf %74, %75 : vector<8x8xf32>
    %cst_27 = arith.constant dense<0xFF800000> : vector<8xf32>
    %77 = vector.multi_reduction <maximumf>, %76, %cst_27 [1] : vector<8x8xf32> to vector<8xf32>
    %78 = vector.shape_cast %77 : vector<8xf32> to vector<8x1xf32>
    %79 = vector.broadcast %78 : vector<8x1xf32> to vector<8x8xf32>
    %80 = arith.subf %76, %79 : vector<8x8xf32>
    %81 = math.exp %80 : vector<8x8xf32>
    %cst_28 = arith.constant dense<0.000000e+00> : vector<8xf32>
    %82 = vector.multi_reduction <add>, %81, %cst_28 [1] : vector<8x8xf32> to vector<8xf32>
    %83 = vector.shape_cast %82 : vector<8xf32> to vector<8x1xf32>
    %84 = tpu.reciprocal %83 {approx = true} : vector<8x1xf32> -> vector<8x1xf32>
    %85 = vector.broadcast %84 : vector<8x1xf32> to vector<8x8xf32>
    %86 = arith.mulf %81, %85 : vector<8x8xf32>
    %87 = arith.truncf %86 : vector<8x8xf32> to vector<8x8xbf16>
    %cst_29 = arith.constant dense<0.000000e+00> : vector<8x16xf32>
    %88 = tpu.matmul %87, %70, %cst_29 {dimension_numbers = #tpu.dot_dimension_numbers<[1], [0], [0], [1], [0, 0, 1, 1], [], []>} : vector<8x8xbf16>, vector<8x16xbf16>, vector<8x16xf32> -> vector<8x16xf32>
    %c0_30 = arith.constant 0 : index
    %c32 = arith.constant 32 : index
    %89 = vector.load %arg23[%c0_30, %c32] : memref<16x64xf32, #tpu.memory_space<vmem>>, vector<8x16xf32>
    tpu.vector_store %arg23[%c0_30, %c32], %88 {strides = array<i32>} : memref<16x64xf32, #tpu.memory_space<vmem>>, vector<8x16xf32>,
    %90 = vector.extract_strided_slice %13 {offsets = [0, 48], sizes = [8, 16], strides = [1, 1]} : vector<16x64xbf16> to vector<8x16xbf16>
    %91 = vector.extract_strided_slice %15 {offsets = [0, 48], sizes = [8, 16], strides = [1, 1]} : vector<16x64xbf16> to vector<8x16xbf16>
    %92 = vector.extract_strided_slice %17 {offsets = [0, 48], sizes = [8, 16], strides = [1, 1]} : vector<16x64xbf16> to vector<8x16xbf16>
    %93 = tpu.transpose %91, [1, 0] : vector<8x16xbf16> -> vector<16x8xbf16>
    %cst_31 = arith.constant dense<0.000000e+00> : vector<8x8xf32>
    %94 = tpu.matmul %90, %93, %cst_31 {dimension_numbers = #tpu.dot_dimension_numbers<[1], [0], [0], [1], [0, 0, 1, 1], [], []>} : vector<8x16xbf16>, vector<16x8xbf16>, vector<8x8xf32> -> vector<8x8xf32>
    %cst_32 = arith.constant 2.500000e-01 : f32
    %95 = vector.broadcast %cst_32 : f32 to vector<8x8xf32>
    %96 = arith.mulf %94, %95 : vector<8x8xf32>
    %97 = vector.broadcast %23 : vector<1x8xf32> to vector<8x8xf32>
    %98 = arith.addf %96, %97 : vector<8x8xf32>
    %cst_33 = arith.constant dense<0xFF800000> : vector<8xf32>
    %99 = vector.multi_reduction <maximumf>, %98, %cst_33 [1] : vector<8x8xf32> to vector<8xf32>
    %100 = vector.shape_cast %99 : vector<8xf32> to vector<8x1xf32>
    %101 = vector.broadcast %100 : vector<8x1xf32> to vector<8x8xf32>
    %102 = arith.subf %98, %101 : vector<8x8xf32>
    %103 = math.exp %102 : vector<8x8xf32>
    %cst_34 = arith.constant dense<0.000000e+00> : vector<8xf32>
    %104 = vector.multi_reduction <add>, %103, %cst_34 [1] : vector<8x8xf32> to vector<8xf32>
    %105 = vector.shape_cast %104 : vector<8xf32> to vector<8x1xf32>
    %106 = tpu.reciprocal %105 {approx = true} : vector<8x1xf32> -> vector<8x1xf32>
    %107 = vector.broadcast %106 : vector<8x1xf32> to vector<8x8xf32>
    %108 = arith.mulf %103, %107 : vector<8x8xf32>
    %109 = arith.truncf %108 : vector<8x8xf32> to vector<8x8xbf16>
    %cst_35 = arith.constant dense<0.000000e+00> : vector<8x16xf32>
    %110 = tpu.matmul %109, %92, %cst_35 {dimension_numbers = #tpu.dot_dimension_numbers<[1], [0], [0], [1], [0, 0, 1, 1], [], []>} : vector<8x8xbf16>, vector<8x16xbf16>, vector<8x16xf32> -> vector<8x16xf32>
    %c0_36 = arith.constant 0 : index
    %c48 = arith.constant 48 : index
    %111 = vector.load %arg23[%c0_36, %c48] : memref<16x64xf32, #tpu.memory_space<vmem>>, vector<8x16xf32>
    tpu.vector_store %arg23[%c0_36, %c48], %110 {strides = array<i32>} : memref<16x64xf32, #tpu.memory_space<vmem>>, vector<8x16xf32>,
    %112 = vector.extract_strided_slice %22 {offsets = [1, 0], sizes = [1, 8], strides = [1, 1]} : vector<2x8xf32> to vector<1x8xf32>
    %113 = vector.extract_strided_slice %13 {offsets = [8, 0], sizes = [8, 16], strides = [1, 1]} : vector<16x64xbf16> to vector<8x16xbf16>
    %114 = vector.extract_strided_slice %15 {offsets = [8, 0], sizes = [8, 16], strides = [1, 1]} : vector<16x64xbf16> to vector<8x16xbf16>
    %115 = vector.extract_strided_slice %17 {offsets = [8, 0], sizes = [8, 16], strides = [1, 1]} : vector<16x64xbf16> to vector<8x16xbf16>
    %116 = tpu.transpose %114, [1, 0] : vector<8x16xbf16> -> vector<16x8xbf16>
    %cst_37 = arith.constant dense<0.000000e+00> : vector<8x8xf32>
    %117 = tpu.matmul %113, %116, %cst_37 {dimension_numbers = #tpu.dot_dimension_numbers<[1], [0], [0], [1], [0, 0, 1, 1], [], []>} : vector<8x16xbf16>, vector<16x8xbf16>, vector<8x8xf32> -> vector<8x8xf32>
    %cst_38 = arith.constant 2.500000e-01 : f32
    %118 = vector.broadcast %cst_38 : f32 to vector<8x8xf32>
    %119 = arith.mulf %117, %118 : vector<8x8xf32>
    %120 = vector.broadcast %112 : vector<1x8xf32> to vector<8x8xf32>
    %121 = arith.addf %119, %120 : vector<8x8xf32>
    %cst_39 = arith.constant dense<0xFF800000> : vector<8xf32>
    %122 = vector.multi_reduction <maximumf>, %121, %cst_39 [1] : vector<8x8xf32> to vector<8xf32>
    %123 = vector.shape_cast %122 : vector<8xf32> to vector<8x1xf32>
    %124 = vector.broadcast %123 : vector<8x1xf32> to vector<8x8xf32>
    %125 = arith.subf %121, %124 : vector<8x8xf32>
    %126 = math.exp %125 : vector<8x8xf32>
    %cst_40 = arith.constant dense<0.000000e+00> : vector<8xf32>
    %127 = vector.multi_reduction <add>, %126, %cst_40 [1] : vector<8x8xf32> to vector<8xf32>
    %128 = vector.shape_cast %127 : vector<8xf32> to vector<8x1xf32>
    %129 = tpu.reciprocal %128 {approx = true} : vector<8x1xf32> -> vector<8x1xf32>
    %130 = vector.broadcast %129 : vector<8x1xf32> to vector<8x8xf32>
    %131 = arith.mulf %126, %130 : vector<8x8xf32>
    %132 = arith.truncf %131 : vector<8x8xf32> to vector<8x8xbf16>
    %cst_41 = arith.constant dense<0.000000e+00> : vector<8x16xf32>
    %133 = tpu.matmul %132, %115, %cst_41 {dimension_numbers = #tpu.dot_dimension_numbers<[1], [0], [0], [1], [0, 0, 1, 1], [], []>} : vector<8x8xbf16>, vector<8x16xbf16>, vector<8x16xf32> -> vector<8x16xf32>
    %c8 = arith.constant 8 : index
    %c0_42 = arith.constant 0 : index
    %134 = vector.load %arg23[%c8, %c0_42] : memref<16x64xf32, #tpu.memory_space<vmem>>, vector<8x16xf32>
    tpu.vector_store %arg23[%c8, %c0_42], %133 {strides = array<i32>} : memref<16x64xf32, #tpu.memory_space<vmem>>, vector<8x16xf32>,
    %135 = vector.extract_strided_slice %13 {offsets = [8, 16], sizes = [8, 16], strides = [1, 1]} : vector<16x64xbf16> to vector<8x16xbf16>
    %136 = vector.extract_strided_slice %15 {offsets = [8, 16], sizes = [8, 16], strides = [1, 1]} : vector<16x64xbf16> to vector<8x16xbf16>
    %137 = vector.extract_strided_slice %17 {offsets = [8, 16], sizes = [8, 16], strides = [1, 1]} : vector<16x64xbf16> to vector<8x16xbf16>
    %138 = tpu.transpose %136, [1, 0] : vector<8x16xbf16> -> vector<16x8xbf16>
    %cst_43 = arith.constant dense<0.000000e+00> : vector<8x8xf32>
    %139 = tpu.matmul %135, %138, %cst_43 {dimension_numbers = #tpu.dot_dimension_numbers<[1], [0], [0], [1], [0, 0, 1, 1], [], []>} : vector<8x16xbf16>, vector<16x8xbf16>, vector<8x8xf32> -> vector<8x8xf32>
    %cst_44 = arith.constant 2.500000e-01 : f32
    %140 = vector.broadcast %cst_44 : f32 to vector<8x8xf32>
    %141 = arith.mulf %139, %140 : vector<8x8xf32>
    %142 = vector.broadcast %112 : vector<1x8xf32> to vector<8x8xf32>
    %143 = arith.addf %141, %142 : vector<8x8xf32>
    %cst_45 = arith.constant dense<0xFF800000> : vector<8xf32>
    %144 = vector.multi_reduction <maximumf>, %143, %cst_45 [1] : vector<8x8xf32> to vector<8xf32>
    %145 = vector.shape_cast %144 : vector<8xf32> to vector<8x1xf32>
    %146 = vector.broadcast %145 : vector<8x1xf32> to vector<8x8xf32>
    %147 = arith.subf %143, %146 : vector<8x8xf32>
    %148 = math.exp %147 : vector<8x8xf32>
    %cst_46 = arith.constant dense<0.000000e+00> : vector<8xf32>
    %149 = vector.multi_reduction <add>, %148, %cst_46 [1] : vector<8x8xf32> to vector<8xf32>
    %150 = vector.shape_cast %149 : vector<8xf32> to vector<8x1xf32>
    %151 = tpu.reciprocal %150 {approx = true} : vector<8x1xf32> -> vector<8x1xf32>
    %152 = vector.broadcast %151 : vector<8x1xf32> to vector<8x8xf32>
    %153 = arith.mulf %148, %152 : vector<8x8xf32>
    %154 = arith.truncf %153 : vector<8x8xf32> to vector<8x8xbf16>
    %cst_47 = arith.constant dense<0.000000e+00> : vector<8x16xf32>
    %155 = tpu.matmul %154, %137, %cst_47 {dimension_numbers = #tpu.dot_dimension_numbers<[1], [0], [0], [1], [0, 0, 1, 1], [], []>} : vector<8x8xbf16>, vector<8x16xbf16>, vector<8x16xf32> -> vector<8x16xf32>
    %c8_48 = arith.constant 8 : index
    %c16_49 = arith.constant 16 : index
    %156 = vector.load %arg23[%c8_48, %c16_49] : memref<16x64xf32, #tpu.memory_space<vmem>>, vector<8x16xf32>
    tpu.vector_store %arg23[%c8_48, %c16_49], %155 {strides = array<i32>} : memref<16x64xf32, #tpu.memory_space<vmem>>, vector<8x16xf32>,
    %157 = vector.extract_strided_slice %13 {offsets = [8, 32], sizes = [8, 16], strides = [1, 1]} : vector<16x64xbf16> to vector<8x16xbf16>
    %158 = vector.extract_strided_slice %15 {offsets = [8, 32], sizes = [8, 16], strides = [1, 1]} : vector<16x64xbf16> to vector<8x16xbf16>
    %159 = vector.extract_strided_slice %17 {offsets = [8, 32], sizes = [8, 16], strides = [1, 1]} : vector<16x64xbf16> to vector<8x16xbf16>
    %160 = tpu.transpose %158, [1, 0] : vector<8x16xbf16> -> vector<16x8xbf16>
    %cst_50 = arith.constant dense<0.000000e+00> : vector<8x8xf32>
    %161 = tpu.matmul %157, %160, %cst_50 {dimension_numbers = #tpu.dot_dimension_numbers<[1], [0], [0], [1], [0, 0, 1, 1], [], []>} : vector<8x16xbf16>, vector<16x8xbf16>, vector<8x8xf32> -> vector<8x8xf32>
    %cst_51 = arith.constant 2.500000e-01 : f32
    %162 = vector.broadcast %cst_51 : f32 to vector<8x8xf32>
    %163 = arith.mulf %161, %162 : vector<8x8xf32>
    %164 = vector.broadcast %112 : vector<1x8xf32> to vector<8x8xf32>
    %165 = arith.addf %163, %164 : vector<8x8xf32>
    %cst_52 = arith.constant dense<0xFF800000> : vector<8xf32>
    %166 = vector.multi_reduction <maximumf>, %165, %cst_52 [1] : vector<8x8xf32> to vector<8xf32>
    %167 = vector.shape_cast %166 : vector<8xf32> to vector<8x1xf32>
    %168 = vector.broadcast %167 : vector<8x1xf32> to vector<8x8xf32>
    %169 = arith.subf %165, %168 : vector<8x8xf32>
    %170 = math.exp %169 : vector<8x8xf32>
    %cst_53 = arith.constant dense<0.000000e+00> : vector<8xf32>
    %171 = vector.multi_reduction <add>, %170, %cst_53 [1] : vector<8x8xf32> to vector<8xf32>
    %172 = vector.shape_cast %171 : vector<8xf32> to vector<8x1xf32>
    %173 = tpu.reciprocal %172 {approx = true} : vector<8x1xf32> -> vector<8x1xf32>
    %174 = vector.broadcast %173 : vector<8x1xf32> to vector<8x8xf32>
    %175 = arith.mulf %170, %174 : vector<8x8xf32>
    %176 = arith.truncf %175 : vector<8x8xf32> to vector<8x8xbf16>
    %cst_54 = arith.constant dense<0.000000e+00> : vector<8x16xf32>
    %177 = tpu.matmul %176, %159, %cst_54 {dimension_numbers = #tpu.dot_dimension_numbers<[1], [0], [0], [1], [0, 0, 1, 1], [], []>} : vector<8x8xbf16>, vector<8x16xbf16>, vector<8x16xf32> -> vector<8x16xf32>
    %c8_55 = arith.constant 8 : index
    %c32_56 = arith.constant 32 : index
    %178 = vector.load %arg23[%c8_55, %c32_56] : memref<16x64xf32, #tpu.memory_space<vmem>>, vector<8x16xf32>
    tpu.vector_store %arg23[%c8_55, %c32_56], %177 {strides = array<i32>} : memref<16x64xf32, #tpu.memory_space<vmem>>, vector<8x16xf32>,
    %179 = vector.extract_strided_slice %13 {offsets = [8, 48], sizes = [8, 16], strides = [1, 1]} : vector<16x64xbf16> to vector<8x16xbf16>
    %180 = vector.extract_strided_slice %15 {offsets = [8, 48], sizes = [8, 16], strides = [1, 1]} : vector<16x64xbf16> to vector<8x16xbf16>
    %181 = vector.extract_strided_slice %17 {offsets = [8, 48], sizes = [8, 16], strides = [1, 1]} : vector<16x64xbf16> to vector<8x16xbf16>
    %182 = tpu.transpose %180, [1, 0] : vector<8x16xbf16> -> vector<16x8xbf16>
    %cst_57 = arith.constant dense<0.000000e+00> : vector<8x8xf32>
    %183 = tpu.matmul %179, %182, %cst_57 {dimension_numbers = #tpu.dot_dimension_numbers<[1], [0], [0], [1], [0, 0, 1, 1], [], []>} : vector<8x16xbf16>, vector<16x8xbf16>, vector<8x8xf32> -> vector<8x8xf32>
    %cst_58 = arith.constant 2.500000e-01 : f32
    %184 = vector.broadcast %cst_58 : f32 to vector<8x8xf32>
    %185 = arith.mulf %183, %184 : vector<8x8xf32>
    %186 = vector.broadcast %112 : vector<1x8xf32> to vector<8x8xf32>
    %187 = arith.addf %185, %186 : vector<8x8xf32>
    %cst_59 = arith.constant dense<0xFF800000> : vector<8xf32>
    %188 = vector.multi_reduction <maximumf>, %187, %cst_59 [1] : vector<8x8xf32> to vector<8xf32>
    %189 = vector.shape_cast %188 : vector<8xf32> to vector<8x1xf32>
    %190 = vector.broadcast %189 : vector<8x1xf32> to vector<8x8xf32>
    %191 = arith.subf %187, %190 : vector<8x8xf32>
    %192 = math.exp %191 : vector<8x8xf32>
    %cst_60 = arith.constant dense<0.000000e+00> : vector<8xf32>
    %193 = vector.multi_reduction <add>, %192, %cst_60 [1] : vector<8x8xf32> to vector<8xf32>
    %194 = vector.shape_cast %193 : vector<8xf32> to vector<8x1xf32>
    %195 = tpu.reciprocal %194 {approx = true} : vector<8x1xf32> -> vector<8x1xf32>
    %196 = vector.broadcast %195 : vector<8x1xf32> to vector<8x8xf32>
    %197 = arith.mulf %192, %196 : vector<8x8xf32>
    %198 = arith.truncf %197 : vector<8x8xf32> to vector<8x8xbf16>
    %cst_61 = arith.constant dense<0.000000e+00> : vector<8x16xf32>
    %199 = tpu.matmul %198, %181, %cst_61 {dimension_numbers = #tpu.dot_dimension_numbers<[1], [0], [0], [1], [0, 0, 1, 1], [], []>} : vector<8x8xbf16>, vector<8x16xbf16>, vector<8x16xf32> -> vector<8x16xf32>
    %c8_62 = arith.constant 8 : index
    %c48_63 = arith.constant 48 : index
    %200 = vector.load %arg23[%c8_62, %c48_63] : memref<16x64xf32, #tpu.memory_space<vmem>>, vector<8x16xf32>
    tpu.vector_store %arg23[%c8_62, %c48_63], %199 {strides = array<i32>} : memref<16x64xf32, #tpu.memory_space<vmem>>, vector<8x16xf32>,
    %c0_64 = arith.constant 0 : index
    %c0_65 = arith.constant 0 : index
    %201 = vector.load %arg23[%c0_64, %c0_65] : memref<16x64xf32, #tpu.memory_space<vmem>>, vector<16x64xf32>
    %202 = arith.truncf %201 : vector<16x64xf32> to vector<16x64xbf16>
    %c0_66 = arith.constant 0 : index
    %c0_67 = arith.constant 0 : index
    %c0_68 = arith.constant 0 : index
    %203 = vector.load %arg7[%c0_66, %c0_67, %c0_68] : memref<1x64x64xbf16, #tpu.memory_space<vmem>>, vector<1x64x64xbf16>
    %204 = vector.shape_cast %203 : vector<1x64x64xbf16> to vector<64x64xbf16>
    %cst_69 = arith.constant dense<0.000000e+00> : vector<16x64xf32>
    %205 = tpu.matmul %202, %204, %cst_69 {dimension_numbers = #tpu.dot_dimension_numbers<[1], [0], [0], [1], [0, 0, 1, 1], [], []>} : vector<16x64xbf16>, vector<64x64xbf16>, vector<16x64xf32> -> vector<16x64xf32>
    %c0_70 = arith.constant 0 : index
    %c0_71 = arith.constant 0 : index
    %c0_72 = arith.constant 0 : index
    %206 = vector.load %arg8[%c0_70, %c0_71, %c0_72] : memref<1x1x64xf32, #tpu.memory_space<vmem>>, vector<1x1x64xf32>
    %207 = vector.shape_cast %206 : vector<1x1x64xf32> to vector<1x64xf32>
    %208 = vector.broadcast %207 : vector<1x64xf32> to vector<16x64xf32>
    %209 = arith.addf %205, %208 : vector<16x64xf32>
    %210 = arith.addf %209, %3 : vector<16x64xf32>
    %c0_73 = arith.constant 0 : index
    %c0_74 = arith.constant 0 : index
    %c0_75 = arith.constant 0 : index
    %211 = vector.load %arg9[%c0_73, %c0_74, %c0_75] : memref<1x1x64xf32, #tpu.memory_space<vmem>>, vector<1x1x64xf32>
    %212 = vector.shape_cast %211 : vector<1x1x64xf32> to vector<1x64xf32>
    %c0_76 = arith.constant 0 : index
    %c0_77 = arith.constant 0 : index
    %c0_78 = arith.constant 0 : index
    %213 = vector.load %arg10[%c0_76, %c0_77, %c0_78] : memref<1x1x64xf32, #tpu.memory_space<vmem>>, vector<1x1x64xf32>
    %214 = vector.shape_cast %213 : vector<1x1x64xf32> to vector<1x64xf32>
    %cst_79 = arith.constant dense<0.000000e+00> : vector<16xf32>
    %215 = vector.multi_reduction <add>, %210, %cst_79 [1] : vector<16x64xf32> to vector<16xf32>
    %216 = vector.shape_cast %215 : vector<16xf32> to vector<16x1xf32>
    %cst_80 = arith.constant 6.400000e+01 : f32
    %217 = vector.broadcast %cst_80 : f32 to vector<16x1xf32>
    %218 = arith.divf %216, %217 : vector<16x1xf32>
    %219 = vector.broadcast %218 : vector<16x1xf32> to vector<16x64xf32>
    %220 = arith.subf %210, %219 : vector<16x64xf32>
    %221 = vector.broadcast %218 : vector<16x1xf32> to vector<16x64xf32>
    %222 = arith.subf %210, %221 : vector<16x64xf32>
    %223 = arith.mulf %220, %222 : vector<16x64xf32>
    %cst_81 = arith.constant dense<0.000000e+00> : vector<16xf32>
    %224 = vector.multi_reduction <add>, %223, %cst_81 [1] : vector<16x64xf32> to vector<16xf32>
    %225 = vector.shape_cast %224 : vector<16xf32> to vector<16x1xf32>
    %cst_82 = arith.constant 6.400000e+01 : f32
    %226 = vector.broadcast %cst_82 : f32 to vector<16x1xf32>
    %227 = arith.divf %225, %226 : vector<16x1xf32>
    %228 = vector.broadcast %218 : vector<16x1xf32> to vector<16x64xf32>
    %229 = arith.subf %210, %228 : vector<16x64xf32>
    %cst_83 = arith.constant 9.99999996E-13 : f32
    %230 = vector.broadcast %cst_83 : f32 to vector<16x1xf32>
    %231 = arith.addf %227, %230 : vector<16x1xf32>
    %232 = math.rsqrt %231 : vector<16x1xf32>
    %233 = vector.broadcast %232 : vector<16x1xf32> to vector<16x64xf32>
    %234 = arith.mulf %229, %233 : vector<16x64xf32>
    %235 = vector.broadcast %212 : vector<1x64xf32> to vector<16x64xf32>
    %236 = arith.mulf %234, %235 : vector<16x64xf32>
    %237 = vector.broadcast %214 : vector<1x64xf32> to vector<16x64xf32>
    %238 = arith.addf %236, %237 : vector<16x64xf32>
    %239 = arith.truncf %238 : vector<16x64xf32> to vector<16x64xbf16>
    %c0_84 = arith.constant 0 : index
    %c0_85 = arith.constant 0 : index
    %c0_86 = arith.constant 0 : index
    %240 = vector.load %arg11[%c0_84, %c0_85, %c0_86] : memref<1x64x128xbf16, #tpu.memory_space<vmem>>, vector<1x64x128xbf16>
    %241 = vector.shape_cast %240 : vector<1x64x128xbf16> to vector<64x128xbf16>
    %cst_87 = arith.constant dense<0.000000e+00> : vector<16x128xf32>
    %242 = tpu.matmul %239, %241, %cst_87 {dimension_numbers = #tpu.dot_dimension_numbers<[1], [0], [0], [1], [0, 0, 1, 1], [], []>} : vector<16x64xbf16>, vector<64x128xbf16>, vector<16x128xf32> -> vector<16x128xf32>
    %c0_88 = arith.constant 0 : index
    %c0_89 = arith.constant 0 : index
    %c0_90 = arith.constant 0 : index
    %243 = vector.load %arg12[%c0_88, %c0_89, %c0_90] : memref<1x1x128xf32, #tpu.memory_space<vmem>>, vector<1x1x128xf32>
    %244 = vector.shape_cast %243 : vector<1x1x128xf32> to vector<1x128xf32>
    %245 = vector.broadcast %244 : vector<1x128xf32> to vector<16x128xf32>
    %246 = arith.addf %242, %245 : vector<16x128xf32>
    %247 = arith.mulf %246, %246 : vector<16x128xf32>
    %248 = arith.mulf %246, %247 : vector<16x128xf32>
    %cst_91 = arith.constant 4.471500e-02 : f32
    %249 = vector.broadcast %cst_91 : f32 to vector<16x128xf32>
    %250 = arith.mulf %249, %248 : vector<16x128xf32>
    %251 = arith.addf %246, %250 : vector<16x128xf32>
    %cst_92 = arith.constant 0.797884583 : f32
    %252 = vector.broadcast %cst_92 : f32 to vector<16x128xf32>
    %253 = arith.mulf %252, %251 : vector<16x128xf32>
    %254 = math.tanh %253 : vector<16x128xf32>
    %cst_93 = arith.constant 1.000000e+00 : f32
    %255 = vector.broadcast %cst_93 : f32 to vector<16x128xf32>
    %256 = arith.addf %255, %254 : vector<16x128xf32>
    %cst_94 = arith.constant 5.000000e-01 : f32
    %257 = vector.broadcast %cst_94 : f32 to vector<16x128xf32>
    %258 = arith.mulf %257, %256 : vector<16x128xf32>
    %259 = arith.mulf %246, %258 : vector<16x128xf32>
    %260 = arith.truncf %259 : vector<16x128xf32> to vector<16x128xbf16>
    %c0_95 = arith.constant 0 : index
    %c0_96 = arith.constant 0 : index
    %c0_97 = arith.constant 0 : index
    %261 = vector.load %arg13[%c0_95, %c0_96, %c0_97] : memref<1x128x64xbf16, #tpu.memory_space<vmem>>, vector<1x128x64xbf16>
    %262 = vector.shape_cast %261 : vector<1x128x64xbf16> to vector<128x64xbf16>
    %cst_98 = arith.constant dense<0.000000e+00> : vector<16x64xf32>
    %263 = tpu.matmul %260, %262, %cst_98 {dimension_numbers = #tpu.dot_dimension_numbers<[1], [0], [0], [1], [0, 0, 1, 1], [], []>} : vector<16x128xbf16>, vector<128x64xbf16>, vector<16x64xf32> -> vector<16x64xf32>
    %c0_99 = arith.constant 0 : index
    %c0_100 = arith.constant 0 : index
    %c0_101 = arith.constant 0 : index
    %264 = vector.load %arg14[%c0_99, %c0_100, %c0_101] : memref<1x1x64xf32, #tpu.memory_space<vmem>>, vector<1x1x64xf32>
    %265 = vector.shape_cast %264 : vector<1x1x64xf32> to vector<1x64xf32>
    %266 = vector.broadcast %265 : vector<1x64xf32> to vector<16x64xf32>
    %267 = arith.addf %263, %266 : vector<16x64xf32>
    %268 = arith.addf %267, %238 : vector<16x64xf32>
    %c0_102 = arith.constant 0 : index
    %c0_103 = arith.constant 0 : index
    %c0_104 = arith.constant 0 : index
    %269 = vector.load %arg15[%c0_102, %c0_103, %c0_104] : memref<1x1x64xf32, #tpu.memory_space<vmem>>, vector<1x1x64xf32>
    %270 = vector.shape_cast %269 : vector<1x1x64xf32> to vector<1x64xf32>
    %c0_105 = arith.constant 0 : index
    %c0_106 = arith.constant 0 : index
    %c0_107 = arith.constant 0 : index
    %271 = vector.load %arg16[%c0_105, %c0_106, %c0_107] : memref<1x1x64xf32, #tpu.memory_space<vmem>>, vector<1x1x64xf32>
    %272 = vector.shape_cast %271 : vector<1x1x64xf32> to vector<1x64xf32>
    %cst_108 = arith.constant dense<0.000000e+00> : vector<16xf32>
    %273 = vector.multi_reduction <add>, %268, %cst_108 [1] : vector<16x64xf32> to vector<16xf32>
    %274 = vector.shape_cast %273 : vector<16xf32> to vector<16x1xf32>
    %cst_109 = arith.constant 6.400000e+01 : f32
    %275 = vector.broadcast %cst_109 : f32 to vector<16x1xf32>
    %276 = arith.divf %274, %275 : vector<16x1xf32>
    %277 = vector.broadcast %276 : vector<16x1xf32> to vector<16x64xf32>
    %278 = arith.subf %268, %277 : vector<16x64xf32>
    %279 = vector.broadcast %276 : vector<16x1xf32> to vector<16x64xf32>
    %280 = arith.subf %268, %279 : vector<16x64xf32>
    %281 = arith.mulf %278, %280 : vector<16x64xf32>
    %cst_110 = arith.constant dense<0.000000e+00> : vector<16xf32>
    %282 = vector.multi_reduction <add>, %281, %cst_110 [1] : vector<16x64xf32> to vector<16xf32>
    %283 = vector.shape_cast %282 : vector<16xf32> to vector<16x1xf32>
    %cst_111 = arith.constant 6.400000e+01 : f32
    %284 = vector.broadcast %cst_111 : f32 to vector<16x1xf32>
    %285 = arith.divf %283, %284 : vector<16x1xf32>
    %286 = vector.broadcast %276 : vector<16x1xf32> to vector<16x64xf32>
    %287 = arith.subf %268, %286 : vector<16x64xf32>
    %cst_112 = arith.constant 9.99999996E-13 : f32
    %288 = vector.broadcast %cst_112 : f32 to vector<16x1xf32>
    %289 = arith.addf %285, %288 : vector<16x1xf32>
    %290 = math.rsqrt %289 : vector<16x1xf32>
    %291 = vector.broadcast %290 : vector<16x1xf32> to vector<16x64xf32>
    %292 = arith.mulf %287, %291 : vector<16x64xf32>
    %293 = vector.broadcast %270 : vector<1x64xf32> to vector<16x64xf32>
    %294 = arith.mulf %292, %293 : vector<16x64xf32>
    %295 = vector.broadcast %272 : vector<1x64xf32> to vector<16x64xf32>
    %296 = arith.addf %294, %295 : vector<16x64xf32>
    %c0_113 = arith.constant 0 : index
    %c0_114 = arith.constant 0 : index
    %297 = vector.load %arg22[%c0_113, %c0_114] : memref<16x64xf32, #tpu.memory_space<vmem>>, vector<16x64xf32>
    tpu.vector_store %arg22[%c0_113, %c0_114], %296 {strides = array<i32>} : memref<16x64xf32, #tpu.memory_space<vmem>>, vector<16x64xf32>,
    %c1_i32 = arith.constant 1 : i32
    %298 = arith.cmpi eq, %arg0, %c1_i32 : i32
    %299 = arith.extui %298 : i1 to i32
    %c0_i32_115 = arith.constant 0 : i32
    %300 = arith.cmpi ne, %299, %c0_i32_115 : i32
    scf.if %300 {
      %301 = vector.extract_strided_slice %296 {offsets = [0, 0], sizes = [1, 64], strides = [1, 1]} : vector<16x64xf32> to vector<1x64xf32>
      %302 = arith.truncf %301 : vector<1x64xf32> to vector<1x64xbf16>
      %c0_116 = arith.constant 0 : index
      %c0_117 = arith.constant 0 : index
      %303 = vector.load %arg17[%c0_116, %c0_117] : memref<64x64xbf16, #tpu.memory_space<vmem>>, vector<64x64xbf16>
      %cst_118 = arith.constant dense<0.000000e+00> : vector<1x64xf32>
      %304 = tpu.matmul %302, %303, %cst_118 {dimension_numbers = #tpu.dot_dimension_numbers<[1], [0], [0], [1], [0, 0, 1, 1], [], []>} : vector<1x64xbf16>, vector<64x64xbf16>, vector<1x64xf32> -> vector<1x64xf32>
      %c0_119 = arith.constant 0 : index
      %c0_120 = arith.constant 0 : index
      %305 = vector.load %arg18[%c0_119, %c0_120] : memref<1x64xf32, #tpu.memory_space<vmem>>, vector<1x64xf32>
      %306 = arith.addf %304, %305 : vector<1x64xf32>
      %307 = math.tanh %306 : vector<1x64xf32>
      %308 = arith.truncf %307 : vector<1x64xf32> to vector<1x64xbf16>
      %c0_121 = arith.constant 0 : index
      %c0_122 = arith.constant 0 : index
      %309 = vector.load %arg19[%c0_121, %c0_122] : memref<64x128xbf16, #tpu.memory_space<vmem>>, vector<64x128xbf16>
      %cst_123 = arith.constant dense<0.000000e+00> : vector<1x128xf32>
      %310 = tpu.matmul %308, %309, %cst_123 {dimension_numbers = #tpu.dot_dimension_numbers<[1], [0], [0], [1], [0, 0, 1, 1], [], []>} : vector<1x64xbf16>, vector<64x128xbf16>, vector<1x128xf32> -> vector<1x128xf32>
      %c0_124 = arith.constant 0 : index
      %c0_125 = arith.constant 0 : index
      %311 = vector.load %arg20[%c0_124, %c0_125] : memref<1x128xf32, #tpu.memory_space<vmem>>, vector<1x128xf32>
      %312 = arith.addf %310, %311 : vector<1x128xf32>
      %c0_126 = arith.constant 0 : index
      %c0_127 = arith.constant 0 : index
      %313 = vector.load %arg21[%c0_126, %c0_127] : memref<2x128xf32, #tpu.memory_space<vmem>>, vector<1x128xf32>
      tpu.vector_store %arg21[%c0_126, %c0_127], %312 {strides = array<i32>} : memref<2x128xf32, #tpu.memory_space<vmem>>, vector<1x128xf32>,
      %314 = vector.extract_strided_slice %296 {offsets = [8, 0], sizes = [1, 64], strides = [1, 1]} : vector<16x64xf32> to vector<1x64xf32>
      %315 = arith.truncf %314 : vector<1x64xf32> to vector<1x64xbf16>
      %c0_128 = arith.constant 0 : index
      %c0_129 = arith.constant 0 : index
      %316 = vector.load %arg17[%c0_128, %c0_129] : memref<64x64xbf16, #tpu.memory_space<vmem>>, vector<64x64xbf16>
      %cst_130 = arith.constant dense<0.000000e+00> : vector<1x64xf32>
      %317 = tpu.matmul %315, %316, %cst_130 {dimension_numbers = #tpu.dot_dimension_numbers<[1], [0], [0], [1], [0, 0, 1, 1], [], []>} : vector<1x64xbf16>, vector<64x64xbf16>, vector<1x64xf32> -> vector<1x64xf32>
      %c0_131 = arith.constant 0 : index
      %c0_132 = arith.constant 0 : index
      %318 = vector.load %arg18[%c0_131, %c0_132] : memref<1x64xf32, #tpu.memory_space<vmem>>, vector<1x64xf32>
      %319 = arith.addf %317, %318 : vector<1x64xf32>
      %320 = math.tanh %319 : vector<1x64xf32>
      %321 = arith.truncf %320 : vector<1x64xf32> to vector<1x64xbf16>
      %c0_133 = arith.constant 0 : index
      %c0_134 = arith.constant 0 : index
      %322 = vector.load %arg19[%c0_133, %c0_134] : memref<64x128xbf16, #tpu.memory_space<vmem>>, vector<64x128xbf16>
      %cst_135 = arith.constant dense<0.000000e+00> : vector<1x128xf32>
      %323 = tpu.matmul %321, %322, %cst_135 {dimension_numbers = #tpu.dot_dimension_numbers<[1], [0], [0], [1], [0, 0, 1, 1], [], []>} : vector<1x64xbf16>, vector<64x128xbf16>, vector<1x128xf32> -> vector<1x128xf32>
      %c0_136 = arith.constant 0 : index
      %c0_137 = arith.constant 0 : index
      %324 = vector.load %arg20[%c0_136, %c0_137] : memref<1x128xf32, #tpu.memory_space<vmem>>, vector<1x128xf32>
      %325 = arith.addf %323, %324 : vector<1x128xf32>
      %c1 = arith.constant 1 : index
      %c0_138 = arith.constant 0 : index
      %326 = vector.load %arg21[%c1, %c0_138] : memref<2x128xf32, #tpu.memory_space<vmem>>, vector<1x128xf32>
      tpu.vector_store %arg21[%c1, %c0_138], %325 {strides = array<i32>} : memref<2x128xf32, #tpu.memory_space<vmem>>, vector<1x128xf32>,
    } else {
    }
    return
  }
  func.func @transform_0(%arg0: i32) -> (i32, i32) {
    %c0_i32 = arith.constant 0 : i32
    %c0_i32_0 = arith.constant 0 : i32
    %c0_i32_1 = arith.constant 0 : i32
    return %c0_i32, %c0_i32_0 : i32, i32
  }
  func.func @transform_1(%arg0: i32) -> (i32, i32) {
    %c0_i32 = arith.constant 0 : i32
    %c0_i32_0 = arith.constant 0 : i32
    %c0_i32_1 = arith.constant 0 : i32
    return %c0_i32, %c0_i32_0 : i32, i32
  }
  func.func @transform_2(%arg0: i32) -> (i32, i32) {
    %c0_i32 = arith.constant 0 : i32
    %c0_i32_0 = arith.constant 0 : i32
    %c0_i32_1 = arith.constant 0 : i32
    return %c0_i32, %c0_i32_0 : i32, i32
  }
  func.func @transform_3(%arg0: i32) -> (i32, i32) {
    %c0_i32 = arith.constant 0 : i32
    %c0_i32_0 = arith.constant 0 : i32
    %c0_i32_1 = arith.constant 0 : i32
    return %c0_i32, %c0_i32_0 : i32, i32
  }
  func.func @transform_4(%arg0: i32) -> (i32, i32, i32) {
    %c0_i32 = arith.constant 0 : i32
    %c0_i32_0 = arith.constant 0 : i32
    %c0_i32_1 = arith.constant 0 : i32
    return %arg0, %c0_i32, %c0_i32_0 : i32, i32, i32
  }
  func.func @transform_5(%arg0: i32) -> (i32, i32, i32) {
    %c0_i32 = arith.constant 0 : i32
    %c0_i32_0 = arith.constant 0 : i32
    %c0_i32_1 = arith.constant 0 : i32
    return %arg0, %c0_i32, %c0_i32_0 : i32, i32, i32
  }
  func.func @transform_6(%arg0: i32) -> (i32, i32, i32) {
    %c0_i32 = arith.constant 0 : i32
    %c0_i32_0 = arith.constant 0 : i32
    %c0_i32_1 = arith.constant 0 : i32
    return %arg0, %c0_i32, %c0_i32_0 : i32, i32, i32
  }
  func.func @transform_7(%arg0: i32) -> (i32, i32, i32) {
    %c0_i32 = arith.constant 0 : i32
    %c0_i32_0 = arith.constant 0 : i32
    %c0_i32_1 = arith.constant 0 : i32
    return %arg0, %c0_i32, %c0_i32_0 : i32, i32, i32
  }
  func.func @transform_8(%arg0: i32) -> (i32, i32, i32) {
    %c0_i32 = arith.constant 0 : i32
    %c0_i32_0 = arith.constant 0 : i32
    %c0_i32_1 = arith.constant 0 : i32
    return %arg0, %c0_i32, %c0_i32_0 : i32, i32, i32
  }
  func.func @transform_9(%arg0: i32) -> (i32, i32, i32) {
    %c0_i32 = arith.constant 0 : i32
    %c0_i32_0 = arith.constant 0 : i32
    %c0_i32_1 = arith.constant 0 : i32
    return %arg0, %c0_i32, %c0_i32_0 : i32, i32, i32
  }
  func.func @transform_10(%arg0: i32) -> (i32, i32, i32) {
    %c0_i32 = arith.constant 0 : i32
    %c0_i32_0 = arith.constant 0 : i32
    %c0_i32_1 = arith.constant 0 : i32
    return %arg0, %c0_i32, %c0_i32_0 : i32, i32, i32
  }
  func.func @transform_11(%arg0: i32) -> (i32, i32, i32) {
    %c0_i32 = arith.constant 0 : i32
    %c0_i32_0 = arith.constant 0 : i32
    %c0_i32_1 = arith.constant 0 : i32
    return %arg0, %c0_i32, %c0_i32_0 : i32, i32, i32
  }
  func.func @transform_12(%arg0: i32) -> (i32, i32, i32) {
    %c0_i32 = arith.constant 0 : i32
    %c0_i32_0 = arith.constant 0 : i32
    %c0_i32_1 = arith.constant 0 : i32
    return %arg0, %c0_i32, %c0_i32_0 : i32, i32, i32
  }
  func.func @transform_13(%arg0: i32) -> (i32, i32, i32) {
    %c0_i32 = arith.constant 0 : i32
    %c0_i32_0 = arith.constant 0 : i32
    %c0_i32_1 = arith.constant 0 : i32
    return %arg0, %c0_i32, %c0_i32_0 : i32, i32, i32
  }
  func.func @transform_14(%arg0: i32) -> (i32, i32, i32) {
    %c0_i32 = arith.constant 0 : i32
    %c0_i32_0 = arith.constant 0 : i32
    %c0_i32_1 = arith.constant 0 : i32
    return %arg0, %c0_i32, %c0_i32_0 : i32, i32, i32
  }
  func.func @transform_15(%arg0: i32) -> (i32, i32, i32) {
    %c0_i32 = arith.constant 0 : i32
    %c0_i32_0 = arith.constant 0 : i32
    %c0_i32_1 = arith.constant 0 : i32
    return %arg0, %c0_i32, %c0_i32_0 : i32, i32, i32
  }
  func.func @transform_16(%arg0: i32) -> (i32, i32) {
    %c0_i32 = arith.constant 0 : i32
    %c0_i32_0 = arith.constant 0 : i32
    %c0_i32_1 = arith.constant 0 : i32
    return %c0_i32, %c0_i32_0 : i32, i32
  }
  func.func @transform_17(%arg0: i32) -> (i32, i32) {
    %c0_i32 = arith.constant 0 : i32
    %c0_i32_0 = arith.constant 0 : i32
    %c0_i32_1 = arith.constant 0 : i32
    return %c0_i32, %c0_i32_0 : i32, i32
  }
  func.func @transform_18(%arg0: i32) -> (i32, i32) {
    %c0_i32 = arith.constant 0 : i32
    %c0_i32_0 = arith.constant 0 : i32
    %c0_i32_1 = arith.constant 0 : i32
    return %c0_i32, %c0_i32_0 : i32, i32
  }
  func.func @transform_19(%arg0: i32) -> (i32, i32) {
    %c0_i32 = arith.constant 0 : i32
    %c0_i32_0 = arith.constant 0 : i32
    %c0_i32_1 = arith.constant 0 : i32
    return %c0_i32, %c0_i32_0 : i32, i32
  }
  func.func @transform_20(%arg0: i32) -> (i32, i32) {
    %c0_i32 = arith.constant 0 : i32
    %c0_i32_0 = arith.constant 0 : i32
    %c0_i32_1 = arith.constant 0 : i32
    return %c0_i32, %c0_i32_0 : i32, i32
  }
}

</mosaic_0001>

<bundles_post_ra>
// kernel: emotion_classifier_forward.1
= control target key start
LH: loop header
LB: loop body
LE: loop exit
PB: predicated region body
PF: predicated region fallthrough
CT: control target
= control target key end

     0   :  { %s3050_s0 = inlined_call_operand.vmem [shape: f32[2,8], index: 0, kind: input, shape index: {}]   ;;  %s3051_s1 = inlined_call_operand.vmem [shape: f32[16,64], index: 1, kind: input, shape index: {}]   ;;  %s3052_s2 = inlined_call_operand.vmem [shape: f32[1,64], index: 2, kind: input, shape index: {}]   ;;  %s3053_s3 = inlined_call_operand.vmem [shape: f32[1,64], index: 3, kind: input, shape index: {}]   ;;  %s3054_s4 = inlined_call_operand.vmem [shape: bf16[2,64,192], index: 4, kind: input, shape index: {}]   ;;  %s3055_s5 = inlined_call_operand.vmem [shape: f32[2,1,192], index: 5, kind: input, shape index: {}]   ;;  %s3056_s6 = inlined_call_operand.vmem [shape: bf16[2,64,64], index: 6, kind: input, shape index: {}]   ;;  %s3057_s7 = inlined_call_operand.vmem [shape: f32[2,1,64], index: 7, kind: input, shape index: {}]   ;;  %s3058_s8 = inlined_call_operand.vmem [shape: f32[2,1,64], index: 8, kind: input, shape index: {}]   ;;  %s3059_s9 = inlined_call_operand.vmem [shape: f32[2,1,64], index: 9, kind: input, shape index: {}]   ;;  %s3060_s10 = inlined_call_operand.vmem [shape: bf16[2,64,128], index: 10, kind: input, shape index: {}]   ;;  %s3061_s11 = inlined_call_operand.vmem [shape: f32[2,1,128], index: 11, kind: input, shape index: {}]   ;;  %s3062_s12 = inlined_call_operand.vmem [shape: bf16[2,128,64], index: 12, kind: input, shape index: {}]   ;;  %s3063_s13 = inlined_call_operand.vmem [shape: f32[2,1,64], index: 13, kind: input, shape index: {}]   ;;  %s3064_s14 = inlined_call_operand.vmem [shape: f32[2,1,64], index: 14, kind: input, shape index: {}]   ;;  %s3065_s15 = inlined_call_operand.vmem [shape: f32[2,1,64], index: 15, kind: input, shape index: {}]   ;;  %s3066_s16 = inlined_call_operand.vmem [shape: bf16[64,64], index: 16, kind: input, shape index: {}]   ;;  %s3067_s17 = inlined_call_operand.vmem [shape: f32[1,64], index: 17, kind: input, shape index: {}]   ;;  %s3068_s18 = inlined_call_operand.vmem [shape: bf16[64,128], index: 18, kind: input, shape index: {}]   ;;  %s3069_s19 = inlined_call_operand.vmem [shape: f32[1,128], index: 19, kind: input, shape index: {}]   ;;  %s3070_s20 = inlined_call_operand.hbm [shape: f32[2,128], index: 20, kind: output, shape index: {}]  }
   0x1   :  { %3077 = sst [smem:[#allocation8_spill]] %s3050_s0 }
   0x2   :  { %3078 = sst [smem:[#allocation9_spill]] %s3051_s1 }
   0x3   :  { %3079 = sst [smem:[#allocation10_spill]] %s3052_s2 }
   0x4   :  { %3080 = sst [smem:[#allocation11_spill]] %s3053_s3 }
   0x5   :  { %3081 = sst [smem:[#allocation12_spill]] %s3054_s4 }
   0x6   :  { %3082 = sst [smem:[#allocation13_spill]] %s3055_s5 }
   0x7   :  { %3083 = sst [smem:[#allocation14_spill]] %s3056_s6 }
   0x8   :  { %3084 = sst [smem:[#allocation15_spill]] %s3066_s16 }
   0x9   :  { %3085 = sst [smem:[#allocation16_spill]] %s3067_s17 }
   0xa   :  { %3086 = sst [smem:[#allocation17_spill]] %s3068_s18 }
   0xb   :  { %3087 = sst [smem:[#allocation18_spill]] %s3069_s19 }
   0xc   :  { %3088 = sst [smem:[#allocation19_spill]] %s3070_s20 }
   0xd   :  { %25 = vsyncpa [#allocation5], 0  ;;  %s2662_s1 = smov 0  }
   0xe LB: > { %3089 = sst [smem:[#allocation7_spill]] %s2545_s1  ;;  %s2668_s22 = sadd.s32 4294967295, %s2545_s1   ;;  %s2545_s1 = sphi %s2662_s1, %s31_s1  }
   0xf   : > { %p2174_p0 = scmp.ge.s32.totalorder %s2545_s1, 1  ;;  %p653_p1 = scmp.lt.s32.totalorder %s2545_s1, 3 }
  0x11   : > { %p654_p2 = pnand %p2174_p0, %p653_p1 }
  0x12   : > { %p746_p3 = scmp.lt.s32.totalorder (!%p654_p2), %s2668_s22, 1  ;;  %s3090_s26 = sld [smem:[#allocation12_spill]] (!%p654_p2) }
  0x13   : > { %657 = sbr.rel (%p654_p2) target bundleno = 2651 (0xa5b), region = 100  ;;  %s3091_s5 = sld [smem:[#allocation13_spill]] (!%p654_p2) }
  0x14   : > { %s3092_s6 = sld [smem:[#allocation14_spill]] (!%p654_p2)  ;;  %p2184_p4 = scmp.ne.s32.totalorder (!%p654_p2), %s2668_s22, 0 }
  0x18   : > { %s2674_s23 = scalar_select %p746_p3, %s2668_s22, 1 }
  0x19   : > { %s3093_s19 = sld [smem:[#allocation9_spill]] (!%p2184_p4) }
  0x1a   : > { %s2374_s24 = sshll.u32 %s2674_s23, 6  ;;  %s2177_s2 = sshll.u32 %s2674_s23, 1 }
  0x1b   : > { %s2681_s27 = scalar_lea.vmem %s3090_s26, %s2374_s24  ;;  %s2686_s29 = scalar_lea.vmem %s3091_s5, %s2177_s2 }
  0x1c   : > { %s2375_s30 = sshll.u32 %s2674_s23, 5  ;;  %s776_s1 = scalar_lea.vmem %s3061_s11, %s2674_s23 }
  0x1d   : > { %s2696_s17 = scalar_lea.vmem %s3092_s6, %s2375_s30  ;;  %s2709_s5 = scalar_lea.vmem %s3060_s10, %s2375_s30 }
  0x1e   : > { %s2718_s6 = scalar_lea.vmem %s3062_s12, %s2374_s24  ;;  %s784_s25 = scalar_lea.vmem %s3063_s13, %s2674_s23 }
  0x1f   : > { %s787_s28 = scalar_lea.vmem %s3064_s14, %s2674_s23  ;;  %s790_s4 = scalar_lea.vmem %s3065_s15, %s2674_s23 }
  0x20   : > { %795 = sbr.rel (%p2184_p4) target bundleno = 315 (0x13b), region = 104  ;;  %s3094_s3 = sld [smem:[#allocation10_spill]] (!%p2184_p4) }
  0x21   : > { %s3095_s30 = sld [smem:[#allocation11_spill]] (!%p2184_p4) }
  0x25   : > { %v796_v0 = vld [vmem:[%s3093_s19] sm:$0xff]  ;;  %vm800_vm0 = vcmask 523264   ;;  %v797_v2 = vld [vmem:[%s3093_s19 + $0x8] sm:$0xff]  ;;  %v2547_v4 = vmov 64.0  }
  0x26   : > { %v801_v1 = vsel %vm800_vm0, %v796_v0, 0.0  ;;  %v804_v3 = vsel %vm800_vm0, %v797_v2, 0.0  ;;  %2444 = vrcp.f32 %v2547_v4  ;;  %v2442_v35 = vld [vmem:[%s3094_s3] ss:$0 sm:$0xff] }
  0x27   : > { %802 = vadd.xlane.f32.xlu0 %v801_v1  ;;  %v2443_v38 = vld [vmem:[%s3095_s30] ss:$0 sm:$0xff] }
  0x2c   : > { %v2445_v5 = vpop.eup %2444 }
  0x2d   : > { %v808_v6 = vmul.f32 64.0, %v2445_v5  ;;  %vm812_vm1 = vweird.f32 %v2445_v5 }
  0x2f   : > { %805 = vadd.xlane.f32.xlu0 %v804_v3  ;;  %v809_v7 = vsub.f32 1.0, %v808_v6 }
  0x31   : > { %v810_v8 = vmul.f32 %v2445_v5, %v809_v7 }
  0x33   : > { %v811_v9 = vadd.f32 %v2445_v5, %v810_v8 }
  0x35   : > { %v813_v10 = vsel %vm812_vm1, %v2445_v5, %v811_v9 }
  0x9a   : > { %v803_v11 = vpop.xlane.xlu0 %802 }
  0x9b   : > { %v814_v12 = vmul.f32 %v813_v10, %v803_v11 }
  0x9d   : > { %v816_v13 = vsub.f32 %v796_v0, %v814_v12 }
  0x9f   : > { %v818_v14 = vmul.f32 %v816_v13, %v816_v13 }
  0xa1   : > { %v820_v15 = vsel %vm800_vm0, %v818_v14, 0.0 }
  0xa2   : > { %821 = vadd.xlane.f32.xlu1 %v820_v15  ;;  %v806_v16 = vpop.xlane.xlu0 %805 }
  0xa3   : > { %v815_v17 = vmul.f32 %v813_v10, %v806_v16 }
  0xa5   : > { %v817_v18 = vsub.f32 %v797_v2, %v815_v17 }
  0xa7   : > { %v819_v19 = vmul.f32 %v817_v18, %v817_v18 }
  0xa9   : > { %v823_v20 = vsel %vm800_vm0, %v819_v19, 0.0 }
  0xaa   : > { %824 = vadd.xlane.f32.xlu1 %v823_v20 }
 0x115   : > { %v822_v21 = vpop.xlane.xlu1 %821 }
 0x116   : > { %v826_v22 = vmul.f32 %v822_v21, %v813_v10 }
 0x118   : > { %v828_v23 = vadd.f32 1e-12, %v826_v22 }
 0x11a   : > { %2446 = vrsqrt.f32 %v828_v23  ;;  %vm836_vm3 = vweird.f32 %v828_v23 }
 0x11d   : > { %v825_v24 = vpop.xlane.xlu1 %824 }
 0x11e   : > { %v827_v25 = vmul.f32 %v825_v24, %v813_v10 }
 0x120   : > { %v2447_v26 = vpop.eup %2446  ;;  %v829_v27 = vadd.f32 1e-12, %v827_v25 }
 0x121   : > { %v831_v28 = vmul.f32 %v2447_v26, %v828_v23  ;;  %vm837_vm2 = vweird.f32 %v2447_v26 }
 0x122   : > { %2448 = vrsqrt.f32 %v829_v27  ;;  %vm838_vm4 = vmor %vm836_vm3, %vm837_vm2  ;;  %vm846_vm6 = vweird.f32 %v829_v27 }
 0x123   : > { %v832_v29 = vmul.f32 %v2447_v26, %v831_v28 }
 0x125   : > { %v833_v30 = vmul.f32 0.5, %v832_v29 }
 0x127   : > { %v834_v31 = vsub.f32 1.5, %v833_v30 }
 0x128   : > { %v2449_v32 = vpop.eup %2448 }
 0x129   : > { %v835_v33 = vmul.f32 %v2447_v26, %v834_v31  ;;  %v841_v34 = vmul.f32 %v2449_v32, %v829_v27  ;;  %vm847_vm5 = vweird.f32 %v2449_v32 }
 0x12a   : > { %vm848_vm7 = vmor %vm846_vm6, %vm847_vm5 }
 0x12b   : > { %v839_v36 = vsel %vm838_vm4, %v2447_v26, %v835_v33  ;;  %v842_v37 = vmul.f32 %v2449_v32, %v841_v34 }
 0x12c   : > { %v850_v39 = vmul.f32 %v839_v36, %v816_v13 }
 0x12d   : > { %v843_v40 = vmul.f32 0.5, %v842_v37 }
 0x12e   : > { %v855_v41 = vmul.f32 %v2442_v35, %v850_v39 }
 0x12f   : > { %v844_v42 = vsub.f32 1.5, %v843_v40 }
 0x130   : > { %v860_v43 = vadd.f32 %v2443_v38, %v855_v41 }
 0x131   : > { %v845_v44 = vmul.f32 %v2449_v32, %v844_v42 }
 0x132   : > { %862 = vst.msk [vmem:[#allocation2] sm:$0xff] %vm800_vm0, %v860_v43 }
 0x133   : > { %v849_v45 = vsel %vm848_vm7, %v2449_v32, %v845_v44 }
 0x134   : > { %v851_v46 = vmul.f32 %v849_v45, %v817_v18 }
 0x136   : > { %v856_v47 = vmul.f32 %v2442_v35, %v851_v46 }
 0x138   : > { %v861_v48 = vadd.f32 %v2443_v38, %v856_v47 }
 0x13a   : > { %863 = vst.msk [vmem:[#allocation2 + $0x8] sm:$0xff] %vm800_vm0, %v861_v48 }
 0x13b PF: > { %v2211_v49 = vld [vmem:[%s2681_s27 + $0x30] sm:$0xf]  ;;  %v2385_v50 = vld [vmem:[%s2681_s27 + $0x34] sm:$0xf0]  ;;  %v2203_v51 = vld [vmem:[%s2681_s27 + $0x20] sm:$0xf] }
 0x13c   : > { %v2212_v52 = vor.u32 %v2385_v50, %v2211_v49  ;;  %v2383_v53 = vld [vmem:[%s2681_s27 + $0x24] sm:$0xf0]  ;;  %v2195_v55 = vld [vmem:[%s2681_s27 + $0x10] sm:$0xf]  ;;  %v2381_v56 = vld [vmem:[%s2681_s27 + $0x14] sm:$0xf0] }
 0x13d   : > { %v2204_v54 = vor.u32 %v2383_v53, %v2203_v51  ;;  %v2196_v57 = vor.u32 %v2381_v56, %v2195_v55  ;;  %v2187_v58 = vld [vmem:[%s2681_s27] sm:$0xf]  ;;  %v2379_v59 = vld [vmem:[%s2681_s27 + $0x4] sm:$0xf0]  ;;  %vm921_vm8 = vcmask 523264   ;;  %s2548_s0 = smov 80  }
 0x13e   : > { %929 = vmatpush.bf16.msra.mxu0 %v2212_v52  ;;  %v2188_v60 = vor.u32 %v2379_v59, %v2187_v58  ;;  %v2759_v61 = vld [vmem:[#allocation2] sm:$0xff]  ;;  %s2549_s21 = smov 112   ;;  %s2550_s24 = smov 64   ;;  %vm965_vm9 = vcmask 130048   ;;  %v2384_v31 = vld [vmem:[%s2681_s27 + $0x34] sm:$0xf] }
 0x13f   : > { %v2770_v0 = vld [vmem:[%s2686_s29] sm:$0x3]  ;;  %s2551_s29 = smov 32   ;;  %s2552_s20 = smov 16   ;;  %v2213_v32 = vld [vmem:[%s2681_s27 + $0x38] sm:$0xf0] }
 0x140   : > { %v877_v1 = vperm.slane %v2770_v0, 0  ;;  %s2553_s16 = smov 48   ;;  %s2554_s18 = smov 96   ;;  %v2216_v33 = vor.u32 %v2384_v31, %v2213_v32  ;;  %v2382_v34 = vld [vmem:[%s2681_s27 + $0x24] sm:$0xf]  ;;  %vm988_vm10 = vcmask 64512  }
 0x141   : > { %v2761_v62 = vld [vmem:[#allocation2 + $0x8] sm:$0xff]  ;;  %v2380_v37 = vld [vmem:[%s2681_s27 + $0x14] sm:$0xf]  ;;  %v2197_v38 = vld [vmem:[%s2681_s27 + $0x18] sm:$0xf0]  ;;  %s3096_s2 = sld [smem:[#allocation8_spill]] }
 0x142   : > { %930 = vmatpush.bf16.msra.mxu0 %v2204_v54  ;;  %v2765_v63 = vpack.c.bf16 %v2761_v62, %v2759_v61  ;;  %v2205_v35 = vld [vmem:[%s2681_s27 + $0x28] sm:$0xf0]  ;;  %943 = vmatpush.bf16.msra.mxu1 %v2216_v33  ;;  %v2200_v39 = vor.u32 %v2380_v37, %v2197_v38  ;;  %v2378_v40 = vld [vmem:[%s2681_s27 + $0x4] sm:$0xf]  ;;  %vm1004_vm11 = vcmask 1043456   ;;  %vm1087_vm12 = vcmask 261248  }
 0x143   : > { %v2208_v36 = vor.u32 %v2382_v34, %v2205_v35  ;;  %v2189_v41 = vld [vmem:[%s2681_s27 + $0x8] sm:$0xf0]  ;;  %vm1151_vm13 = vcmask 392448   ;;  %vm1215_vm14 = vcmask 523648   ;;  %p2301_p5 = scmp.ne.s32.totalorder %s2668_s22, 1 }
 0x144   : > { %v2192_v42 = vor.u32 %v2378_v40, %v2189_v41  ;;  %s3102_s26 = sld [smem:[#allocation16_spill]] (!%p2301_p5) }
 0x145   : > { %s3103_s30 = sld [smem:[#allocation18_spill]] (!%p2301_p5) }
 0x146   : > { %931 = vmatpush.bf16.msra.mxu0 %v2196_v57  ;;  %944 = vmatpush.bf16.msra.mxu1 %v2208_v36 }
 0x147   : > { %v957_v46 = vld [vmem:[%s3096_s2] sm:$0x3] }
 0x148   : > { %v958_v47 = vsub.f32 1.0, %v957_v46 }
 0x14a   : > { %932 = vmatpush.bf16.msra.mxu0 %v2188_v60  ;;  %945 = vmatpush.bf16.msra.mxu1 %v2200_v39  ;;  %v959_v48 = vmul.f32 -1e+09, %v958_v47 }
 0x14c   : > { %v986_v52 = vperm.slane %v959_v48, 0 }
 0x14d   : > { %2217 = vmatmul.msk.bf16.vlgmr.msra.gmra.mxu0 %vm921_vm8, %v2765_v63 }
 0x14e   : > { %946 = vmatpush.bf16.msra.mxu1 %v2192_v42 }
 0x151   : > { %2218 = vmatmul.msk.bf16.vlgmr.msra.gmra.mxu1 %vm921_vm8, %v2765_v63 }
 0x1ca   : > { %v934_v2 = vpop.f32.mrf.mxu0 }
 0x1cb   : > { %v935_v3 = vadd.f32 %v934_v2, %v877_v1 }
 0x1cd   : > { %v953_v4 = vpack.c.bf16 %v935_v3, %v935_v3 }
 0x1ce   : > { %v948_v31 = vpop.f32.mrf.mxu1 }
 0x1cf   : > { %v961_v5 = vunpack.c.l.b16 %v953_v4 }
 0x1d1   : > { %v962_v6 = vpack.c.b16 %v961_v5, %v961_v5 }
 0x1d2   : > { %v936_v7 = vpop.f32.mrf.mxu0 }
 0x1d3   : > { %1153 = vrot.lane.b32.xlu2 %v962_v6, %s2548_s0  ;;  %1022 = vrot.lane.b32.xlu1 %v962_v6, %s2549_s21  ;;  %v937_v8 = vadd.f32 %v936_v7, %v877_v1 }
 0x1d4   : > { %963 = vrot.lane.b32.xlu0 %v962_v6, %s2550_s24 }
 0x1d5   : > { %v954_v9 = vpack.c.bf16 %v937_v8, %v937_v8 }
 0x1d7   : > { %v1218_v10 = vunpack.c.l.b16 %v954_v9 }
 0x1d9   : > { %v1219_v11 = vpack.c.b16 %v1218_v10, %v1218_v10 }
 0x1db   : > { %1091 = vrot.lane.b32.xlu2 %v962_v6, %s2551_s29  ;;  %1155 = vrot.lane.b32.xlu1 %v962_v6, %s2552_s20 }
 0x1dc   : > { %1024 = vrot.lane.b32.xlu0 %v962_v6, %s2553_s16 }
 0x1e3   : > { %1276 = vrot.lane.b32.xlu2 %v1219_v11, %s2549_s21  ;;  %1089 = vrot.lane.b32.xlu1 %v962_v6, %s2554_s18 }
 0x1e4   : > { %1278 = vrot.lane.b32.xlu0 %v1219_v11, %s2553_s16 }
 0x1eb   : > { %1405 = vrot.lane.b32.xlu2 %v1219_v11, %s2548_s0  ;;  %1407 = vrot.lane.b32.xlu1 %v1219_v11, %s2552_s20 }
 0x1ec   : > { %1220 = vrot.lane.b32.xlu0 %v1219_v11, %s2550_s24 }
 0x1f3   : > { %1342 = vrot.lane.b32.xlu1 %v1219_v11, %s2554_s18 }
 0x1f4   : > { %1344 = vrot.lane.b32.xlu0 %v1219_v11, %s2551_s29 }
 0x22d   : > { %v1154_v12 = vpop.permute.xlu2 %1153 }
 0x235   : > { %v1092_v13 = vpop.permute.xlu2 %1091 }
 0x236   : > { %v1097_v14 = vsel %vm965_vm9, %v1092_v13, 0 }
 0x237   : > { %1106 = vmatpush.bf16.xpose.msrb.mxu0 %v1097_v14 }
 0x23d   : > { %v1277_v43 = vpop.permute.xlu2 %1276 }
 0x245   : > { %v1023_v15 = vpop.permute.xlu1 %1022  ;;  %v1406_v45 = vpop.permute.xlu2 %1405 }
 0x246   : > { %v964_v16 = vpop.permute.xlu0 %963 }
 0x247   : > { %v970_v17 = vsel %vm965_vm9, %v964_v16, 0 }
 0x248   : > { %979 = vmatpush.bf16.xpose.msra.mxu2 %v970_v17 }
 0x24d   : > { %v1156_v18 = vpop.permute.xlu1 %1155 }
 0x24e   : > { %v1025_v19 = vpop.permute.xlu0 %1024  ;;  %v1161_v20 = vsel %vm965_vm9, %v1156_v18, 0 }
 0x24f   : > { %2219 = vmatmul.msk.bf16.vlgmr.msra.gmra.mxu2 %vm965_vm9, %v953_v4  ;;  %v1030_v21 = vsel %vm965_vm9, %v1025_v19, 0  ;;  %v1242_v4 = vperm.slane %v959_v48, 1  ;;  %v950_v48 = vpop.f32.mrf.mxu1 }
 0x250   : > { %1039 = vmatpush.bf16.xpose.msra.mxu3 %v1030_v21 }
 0x255   : > { %v1090_v22 = vpop.permute.xlu1 %1089 }
 0x256   : > { %v1279_v23 = vpop.permute.xlu0 %1278  ;;  %2223 = vmatmul.msk.bf16.vlgmr.msrb.gmra.mxu0 %vm965_vm9, %v1090_v22 }
 0x257   : > { %v1284_v24 = vsel %vm965_vm9, %v1279_v23, 0  ;;  %2221 = vmatmul.msk.bf16.vlgmr.msra.gmra.mxu3 %vm965_vm9, %v1023_v15 }
 0x258   : > { %1170 = vmatpush.bf16.xpose.msrb.mxu3 %v1161_v20 }
 0x25d   : > { %v1408_v27 = vpop.permute.xlu1 %1407 }
 0x25e   : > { %v1221_v25 = vpop.permute.xlu0 %1220  ;;  %v1413_v29 = vsel %vm965_vm9, %v1408_v27, 0 }
 0x25f   : > { %v1226_v26 = vsel %vm965_vm9, %v1221_v25, 0 }
 0x260   : > { %1293 = vmatpush.bf16.xpose.msra.mxu3 %v1284_v24  ;;  %1235 = vmatpush.bf16.xpose.msra.mxu0 %v1226_v26 }
 0x265   : > { %v1343_v44 = vpop.permute.xlu1 %1342 }
 0x266   : > { %v1345_v28 = vpop.permute.xlu0 %1344 }
 0x267   : > { %v1350_v30 = vsel %vm965_vm9, %v1345_v28, 0  ;;  %2225 = vmatmul.msk.bf16.vlgmr.msrb.gmra.mxu3 %vm965_vm9, %v1154_v12  ;;  %2227 = vmatmul.msk.bf16.vlgmr.msra.gmra.mxu0 %vm965_vm9, %v954_v9 }
 0x268   : > { %1422 = vmatpush.bf16.xpose.msrb.mxu3 %v1413_v29  ;;  %1359 = vmatpush.bf16.xpose.msrb.mxu0 %v1350_v30  ;;  %v878_v30 = vperm.slane %v2770_v0, 1 }
 0x26a   : > { %v949_v32 = vadd.f32 %v948_v31, %v878_v30 }
 0x26c   : > { %v955_v33 = vpack.c.bf16 %v949_v32, %v949_v32 }
 0x26e   : > { %v1060_v34 = vunpack.c.l.b16 %v955_v33  ;;  %v1006_v39 = vsel %vm1004_vm11, %v955_v33, 0 }
 0x26f   : > { %1015 = vmatpush.bf16.msrb.mxu2 %v1006_v39 }
 0x270   : > { %v1061_v35 = vpack.c.b16 %v1060_v34, %v1060_v34 }
 0x277   : > { %2229 = vmatmul.msk.bf16.vlgmr.msra.gmra.mxu3 %vm965_vm9, %v1277_v43  ;;  %2231 = vmatmul.msk.bf16.vlgmr.msrb.gmra.mxu0 %vm965_vm9, %v1343_v44 }
 0x287   : > { %2233 = vmatmul.msk.bf16.vlgmr.msrb.gmra.mxu3 %vm965_vm9, %v1406_v45 }
 0x2d2   : > { %v981_v49 = vpop.f32.mrf.mxu2 }
 0x2d3   : > { %v1108_v50 = vpop.f32.mrf.mxu0  ;;  %v985_v54 = vmul.f32 0.25, %v981_v49  ;;  %v951_v49 = vadd.f32 %v950_v48, %v878_v30 }
 0x2d4   : > { %v1112_v51 = vmul.f32 0.25, %v1108_v50 }
 0x2d5   : > { %v987_v60 = vadd.f32 %v986_v52, %v985_v54  ;;  %v2842_v50 = vpack.c.bf16 %v951_v49, %v951_v49 }
 0x2d6   : > { %v1113_v53 = vadd.f32 %v1112_v51, %v986_v52 }
 0x2d7   : > { %v989_v2 = vsel %vm988_vm10, %v987_v60, -inf  ;;  %v1260_v31 = vsel %vm1004_vm11, %v2842_v50, 0 }
 0x2d8   : > { %v1114_v55 = vsel %vm988_vm10, %v1113_v53, -inf }
 0x2d9   : > { %1115 = vmax.xlane.f32.xlu2 %v1114_v55 }
 0x2da   : > { %v983_v56 = vpop.f32.mrf.mxu2  ;;  %v1041_v57 = vpop.f32.mrf.mxu3 }
 0x2db   : > { %v1045_v58 = vmul.f32 0.25, %v1041_v57  ;;  %v1110_v59 = vpop.f32.mrf.mxu0 }
 0x2dd   : > { %v2815_v63 = vadd.f32 %v1045_v58, %v986_v52 }
 0x2df   : > { %v1047_v1 = vsel %vm988_vm10, %v2815_v63, -inf }
 0x2e0   : > { %1048 = vmax.xlane.f32.xlu0 %v1047_v1 }
 0x2e1   : > { %990 = vmax.xlane.f32.xlu2 %v989_v2 }
 0x2e2   : > { %v1043_v3 = vpop.f32.mrf.mxu3 }
 0x2e4   : > { %v1237_v5 = vpop.f32.mrf.mxu0 }
 0x2e5   : > { %v1241_v6 = vmul.f32 0.25, %v1237_v5 }
 0x2e7   : > { %v2820_v7 = vadd.f32 %v1242_v4, %v1241_v6 }
 0x2e9   : > { %v1244_v8 = vsel %vm988_vm10, %v2820_v7, -inf }
 0x2ea   : > { %v1172_v9 = vpop.f32.mrf.mxu3  ;;  %1245 = vmax.xlane.f32.xlu1 %v1244_v8 }
 0x2eb   : > { %v1176_v10 = vmul.f32 0.25, %v1172_v9 }
 0x2ec   : > { %v1239_v11 = vpop.f32.mrf.mxu0 }
 0x2ed   : > { %v2824_v12 = vadd.f32 %v1176_v10, %v986_v52 }
 0x2ef   : > { %v1178_v13 = vsel %vm988_vm10, %v2824_v12, -inf }
 0x2f2   : > { %v1174_v14 = vpop.f32.mrf.mxu3  ;;  %1179 = vmax.xlane.f32.xlu1 %v1178_v13 }
 0x2f4   : > { %v1361_v15 = vpop.f32.mrf.mxu0 }
 0x2f5   : > { %v1365_v16 = vmul.f32 0.25, %v1361_v15 }
 0x2f7   : > { %v1366_v17 = vadd.f32 %v1365_v16, %v1242_v4 }
 0x2f9   : > { %v1367_v18 = vsel %vm988_vm10, %v1366_v17, -inf }
 0x2fa   : > { %v1295_v19 = vpop.f32.mrf.mxu3  ;;  %1368 = vmax.xlane.f32.xlu1 %v1367_v18 }
 0x2fb   : > { %v1299_v20 = vmul.f32 0.25, %v1295_v19 }
 0x2fc   : > { %v1363_v21 = vpop.f32.mrf.mxu0 }
 0x2fd   : > { %v1300_v22 = vadd.f32 %v1299_v20, %v1242_v4 }
 0x2ff   : > { %v1301_v23 = vsel %vm988_vm10, %v1300_v22, -inf }
 0x300   : > { %1302 = vmax.xlane.f32.xlu2 %v1301_v23 }
 0x302   : > { %v1297_v24 = vpop.f32.mrf.mxu3 }
 0x30a   : > { %v1424_v25 = vpop.f32.mrf.mxu3 }
 0x30b   : > { %v1428_v26 = vmul.f32 0.25, %v1424_v25 }
 0x30d   : > { %v1429_v27 = vadd.f32 %v1428_v26, %v1242_v4 }
 0x30f   : > { %v1430_v28 = vsel %vm988_vm10, %v1429_v27, -inf }
 0x310   : > { %1431 = vmax.xlane.f32.xlu2 %v1430_v28 }
 0x312   : > { %v1426_v29 = vpop.f32.mrf.mxu3 }
 0x328   : > { %1062 = vrot.lane.b32.xlu2 %v1061_v35, %s2549_s21 }
 0x34c   : > { %v1116_v36 = vpop.xlane.xlu2 %1115 }
 0x34d   : > { %v1117_v37 = vsub.f32 %v1113_v53, %v1116_v36  ;;  %v1314_v53 = vunpack.c.l.b16 %v2842_v50 }
 0x34f   : > { %v1118_v38 = vmul.f32 1.442695, %v1117_v37  ;;  %v1315_v57 = vpack.c.b16 %v1314_v53, %v1314_v53 }
 0x351   : > { %2457 = vpow2.f32 %v1118_v38 }
 0x353   : > { %v1049_v3 = vpop.xlane.xlu0 %1048 }
 0x354   : > { %v991_v40 = vpop.xlane.xlu2 %990  ;;  %v1050_v4 = vsub.f32 %v2815_v63, %v1049_v3 }
 0x355   : > { %v992_v41 = vsub.f32 %v987_v60, %v991_v40 }
 0x356   : > { %v1051_v6 = vmul.f32 1.442695, %v1050_v4 }
 0x357   : > { %v2834_v42 = vpop.eup %2457  ;;  %v993_v0 = vmul.f32 1.442695, %v992_v41 }
 0x358   : > { %v1120_v43 = vsel %vm988_vm10, %v2834_v42, 0.0 }
 0x359   : > { %2459 = vpow2.f32 %v993_v0  ;;  %1121 = vadd.xlane.f32.xlu1 %v1120_v43 }
 0x35d   : > { %v1246_v45 = vpop.xlane.xlu1 %1245 }
 0x35e   : > { %v1247_v9 = vsub.f32 %v2820_v7, %v1246_v45 }
 0x35f   : > { %v2838_v44 = vpop.eup %2459 }
 0x360   : > { %v995_v46 = vsel %vm988_vm10, %v2838_v44, 0.0  ;;  %v1248_v11 = vmul.f32 1.442695, %v1247_v9 }
 0x361   : > { %996 = vadd.xlane.f32.xlu0 %v995_v46 }
 0x365   : > { %v1180_v47 = vpop.xlane.xlu1 %1179 }
 0x366   : > { %v1181_v14 = vsub.f32 %v2824_v12, %v1180_v47 }
 0x368   : > { %v1182_v63 = vmul.f32 1.442695, %v1181_v14 }
 0x36d   : > { %v1369_v51 = vpop.xlane.xlu1 %1368 }
 0x36e   : > { %v1370_v55 = vsub.f32 %v1366_v17, %v1369_v51 }
 0x370   : > { %v1371_v58 = vmul.f32 1.442695, %v1370_v55 }
 0x372   : > { %1126 = vrot.lane.b32.xlu1 %v1061_v35, %s2554_s18 }
 0x373   : > { %v1303_v52 = vpop.xlane.xlu2 %1302 }
 0x374   : > { %v1304_v54 = vsub.f32 %v1300_v22, %v1303_v52 }
 0x375   : > { %1190 = vrot.lane.b32.xlu0 %v1061_v35, %s2548_s0 }
 0x376   : > { %v1305_v56 = vmul.f32 1.442695, %v1304_v54 }
 0x378   : > { %2461 = vpow2.f32 %v1305_v56 }
 0x379   : > { %2463 = vpow2.f32 %v1371_v58 }
 0x37a   : > { %1316 = vrot.lane.b32.xlu1 %v1315_v57, %s2549_s21  ;;  %2465 = vpow2.f32 %v1051_v6  ;;  %s3098_s21 = scalar_lea.vmem %s3058_s8, %s2674_s23 }
 0x37e   : > { %v2848_v59 = vpop.eup %2461 }
 0x37f   : > { %v1307_v60 = vsel %vm988_vm10, %v2848_v59, 0.0  ;;  %v2852_v1 = vpop.eup %2463 }
 0x380   : > { %1308 = vadd.xlane.f32.xlu2 %v1307_v60  ;;  %v1373_v2 = vsel %vm988_vm10, %v2852_v1, 0.0  ;;  %v2466_v13 = vpop.eup %2465 }
 0x381   : > { %v1053_v15 = vsel %vm988_vm10, %v2466_v13, 0.0 }
 0x383   : > { %v1432_v5 = vpop.xlane.xlu2 %1431 }
 0x384   : > { %v1433_v8 = vsub.f32 %v1429_v27, %v1432_v5 }
 0x386   : > { %v1434_v10 = vmul.f32 1.442695, %v1433_v8 }
 0x388   : > { %1374 = vadd.xlane.f32.xlu2 %v1373_v2  ;;  %2467 = vpow2.f32 %v1434_v10 }
 0x389   : > { %2469 = vpow2.f32 %v1248_v11 }
 0x38a   : > { %2471 = vpow2.f32 %v1182_v63 }
 0x38b   : > { %v1063_v20 = vpop.permute.xlu2 %1062 }
 0x38c   : > { %v1068_v21 = vsel %vm1004_vm11, %v1063_v20, 0 }
 0x38d   : > { %1077 = vmatpush.bf16.msra.mxu2 %v1068_v21 }
 0x38e   : > { %v2860_v16 = vpop.eup %2467 }
 0x38f   : > { %v2470_v17 = vpop.eup %2469  ;;  %v1436_v18 = vsel %vm988_vm10, %v2860_v16, 0.0 }
 0x390   : > { %v1250_v7 = vsel %vm988_vm10, %v2470_v17, 0.0  ;;  %v2472_v19 = vpop.eup %2471 }
 0x391   : > { %v1184_v12 = vsel %vm988_vm10, %v2472_v19, 0.0 }
 0x39f   : > { %1054 = vadd.xlane.f32.xlu0 %v1053_v15 }
 0x3a0   : > { %1379 = vrot.lane.b32.xlu2 %v1315_v57, %s2554_s18 }
 0x3a4   : > { %1437 = vadd.xlane.f32.xlu1 %v1436_v18 }
 0x3a7   : > { %1251 = vadd.xlane.f32.xlu0 %v1250_v7 }
 0x3af   : > { %1185 = vadd.xlane.f32.xlu0 %v1184_v12 }
 0x3c3   : > { %1442 = vrot.lane.b32.xlu0 %v1315_v57, %s2548_s0  ;;  %s3097_s0 = scalar_lea.vmem %s3057_s7, %s2674_s23 }
 0x3cc   : > { %v1122_v23 = vpop.xlane.xlu1 %1121 }
 0x3d4   : > { %v997_v22 = vpop.xlane.xlu0 %996 }
 0x3d5   : > { %2473 = vrcp.f32 %v997_v22  ;;  %v2389_v22 = vld [vmem:[%s2696_s17 + $0x18] sm:$0xff] }
 0x3d6   : > { %2475 = vrcp.f32 %v1122_v23  ;;  %1514 = vmatpush.bf16.msra.mxu0 %v2389_v22  ;;  %v2388_v23 = vld [vmem:[%s2696_s17 + $0x10] sm:$0xff] }
 0x3da   : > { %1515 = vmatpush.bf16.msra.mxu0 %v2388_v23 }
 0x3db   : > { %v2474_v24 = vpop.eup %2473 }
 0x3dc   : > { %v999_v25 = vmul.f32 %v2474_v24, %v2838_v44  ;;  %v2476_v27 = vpop.eup %2475  ;;  %v2387_v24 = vld [vmem:[%s2696_s17 + $0x8] sm:$0xff] }
 0x3dd   : > { %v1124_v28 = vmul.f32 %v2476_v27, %v2834_v42 }
 0x3de   : > { %v1000_v26 = vpack.c.bf16 %v999_v25, %v999_v25  ;;  %1516 = vmatpush.bf16.msra.mxu0 %v2387_v24  ;;  %v2386_v25 = vld [vmem:[%s2696_s17] sm:$0xff] }
 0x3df   : > { %v1125_v33 = vpack.c.bf16 %v1124_v28, %v1124_v28 }
 0x3e0   : > { %2220 = vmatmul.msk.bf16.vlgmr.msrb.gmra.mxu2 %vm988_vm10, %v1000_v26 }
 0x3e2   : > { %1517 = vmatpush.bf16.msra.mxu0 %v2386_v25 }
 0x3e4   : > { %v1127_v29 = vpop.permute.xlu1 %1126 }
 0x3e5   : > { %v1132_v30 = vsel %vm1004_vm11, %v1127_v29, 0 }
 0x3e6   : > { %1141 = vmatpush.bf16.msrb.mxu1 %v1132_v30 }
 0x3e7   : > { %v1191_v32 = vpop.permute.xlu0 %1190 }
 0x3e8   : > { %v1196_v34 = vsel %vm1004_vm11, %v1191_v32, 0  ;;  %v2450_v32 = vld [vmem:[%s3097_s0] ss:$0 sm:$0xff] }
 0x3e9   : > { %2224 = vmatmul.msk.bf16.vlgmr.msrb.gmra.mxu1 %vm988_vm10, %v1125_v33  ;;  %1205 = vmatpush.bf16.msrb.mxu2 %v1196_v34 }
 0x3ea   : > { %1269 = vmatpush.bf16.msra.mxu1 %v1260_v31 }
 0x3ec   : > { %v1317_v0 = vpop.permute.xlu1 %1316 }
 0x3ed   : > { %v1322_v44 = vsel %vm1004_vm11, %v1317_v0, 0 }
 0x3f3   : > { %v1309_v35 = vpop.xlane.xlu2 %1308 }
 0x3fb   : > { %v1375_v36 = vpop.xlane.xlu2 %1374 }
 0x403   : > { %v1380_v37 = vpop.permute.xlu2 %1379 }
 0x404   : > { %v1385_v38 = vsel %vm1004_vm11, %v1380_v37, 0 }
 0x405   : > { %1394 = vmatpush.bf16.msrb.mxu1 %v1385_v38 }
 0x412   : > { %v1055_v39 = vpop.xlane.xlu0 %1054 }
 0x413   : > { %2477 = vrcp.f32 %v1055_v39 }
 0x417   : > { %v1438_v2 = vpop.xlane.xlu1 %1437 }
 0x419   : > { %v2478_v40 = vpop.eup %2477 }
 0x41a   : > { %v1057_v41 = vmul.f32 %v2478_v40, %v2466_v13  ;;  %v1252_v42 = vpop.xlane.xlu0 %1251 }
 0x41b   : > { %2479 = vrcp.f32 %v1252_v42 }
 0x41c   : > { %v1058_v43 = vpack.c.bf16 %v1057_v41, %v1057_v41  ;;  %v2555_v41 = vmov 64.0  }
 0x41e   : > { %2222 = vmatmul.msk.bf16.vlgmr.msra.gmra.mxu2 %vm988_vm10, %v1058_v43 }
 0x41f   : > { %1331 = vmatpush.bf16.msra.mxu2 %v1322_v44 }
 0x421   : > { %v2480_v45 = vpop.eup %2479 }
 0x422   : > { %v1254_v46 = vmul.f32 %v2480_v45, %v2470_v17  ;;  %v1186_v47 = vpop.xlane.xlu0 %1185 }
 0x423   : > { %2481 = vrcp.f32 %v1186_v47 }
 0x424   : > { %v1255_v48 = vpack.c.bf16 %v1254_v46, %v1254_v46  ;;  %2483 = vrcp.f32 %v1375_v36 }
 0x425   : > { %2485 = vrcp.f32 %v1309_v35 }
 0x426   : > { %2228 = vmatmul.msk.bf16.vlgmr.msra.gmra.mxu1 %vm988_vm10, %v1255_v48  ;;  %2487 = vrcp.f32 %v1438_v2 }
 0x427   : > { %2489 = vrcp.f32 %v2555_v41 }
 0x429   : > { %v2482_v49 = vpop.eup %2481 }
 0x42a   : > { %v1188_v50 = vmul.f32 %v2482_v49, %v2472_v19  ;;  %v2484_v52 = vpop.eup %2483 }
 0x42b   : > { %v1377_v53 = vmul.f32 %v2484_v52, %v2852_v1  ;;  %v2486_v55 = vpop.eup %2485 }
 0x42c   : > { %v1189_v51 = vpack.c.bf16 %v1188_v50, %v1188_v50  ;;  %v1311_v58 = vmul.f32 %v2486_v55, %v2848_v59  ;;  %v2488_v3 = vpop.eup %2487  ;;  %v2393_v55 = vld [vmem:[%s2709_s5 + $0x18] sm:$0xff] }
 0x42d   : > { %v1378_v54 = vpack.c.bf16 %v1377_v53, %v1377_v53  ;;  %v1440_v4 = vmul.f32 %v2488_v3, %v2860_v16  ;;  %v2490_v42 = vpop.eup %2489  ;;  %1633 = vmatpush.bf16.msra.mxu1 %v2393_v55  ;;  %v2390_v3 = vld [vmem:[%s2709_s5] sm:$0xff] }
 0x42e   : > { %2226 = vmatmul.msk.bf16.vlgmr.msrb.gmra.mxu2 %vm988_vm10, %v1189_v51  ;;  %v1312_v60 = vpack.c.bf16 %v1311_v58, %v1311_v58  ;;  %v1535_v0 = vmul.f32 64.0, %v2490_v42  ;;  %vm1539_vm15 = vweird.f32 %v2490_v42  ;;  %v2391_v58 = vld [vmem:[%s2709_s5 + $0x8] sm:$0xff] }
 0x42f   : > { %v1441_v5 = vpack.c.bf16 %v1440_v4, %v1440_v4 }
 0x430   : > { %v1536_v43 = vsub.f32 1.0, %v1535_v0 }
 0x432   : > { %v1537_v44 = vmul.f32 %v2490_v42, %v1536_v43 }
 0x434   : > { %v1538_v45 = vadd.f32 %v2490_v42, %v1537_v44 }
 0x435   : > { %v1443_v56 = vpop.permute.xlu0 %1442 }
 0x436   : > { %v1448_v57 = vsel %vm1004_vm11, %v1443_v56, 0  ;;  %2232 = vmatmul.msk.bf16.vlgmr.msrb.gmra.mxu1 %vm988_vm10, %v1378_v54  ;;  %v2392_v56 = vld [vmem:[%s2709_s5 + $0x10] sm:$0xff] }
 0x437   : > { %1457 = vmatpush.bf16.msrb.mxu2 %v1448_v57  ;;  %1634 = vmatpush.bf16.msra.mxu1 %v2392_v56 }
 0x43b   : > { %1635 = vmatpush.bf16.msra.mxu1 %v2391_v58 }
 0x43e   : > { %2230 = vmatmul.msk.bf16.vlgmr.msra.gmra.mxu2 %vm988_vm10, %v1312_v60 }
 0x43f   : > { %1636 = vmatpush.bf16.msra.mxu1 %v2390_v3 }
 0x44e   : > { %2234 = vmatmul.msk.bf16.vlgmr.msrb.gmra.mxu2 %vm988_vm10, %v1441_v5 }
 0x463   : > { %v1017_v1 = vpop.f32.mrf.mxu2 }
 0x464   : > { %1021 = vst.msk [vmem:[#allocation3] sm:$0xff] %vm965_vm9, %v1017_v1 }
 0x466   : > { %v1143_v6 = vpop.f32.mrf.mxu1 }
 0x467   : > { %1148 = vrot.lane.b32.xlu2 %v1143_v6, %s2551_s29 }
 0x46b   : > { %v1019_v8 = vpop.f32.mrf.mxu2 }
 0x46e   : > { %v1145_v9 = vpop.f32.mrf.mxu1 }
 0x4a1   : > { %v1079_v59 = vpop.f32.mrf.mxu2 }
 0x4a2   : > { %1084 = vrot.lane.b32.xlu1 %v1079_v59, %s2552_s20 }
 0x4a3   : > { %v1271_v10 = vpop.f32.mrf.mxu1 }
 0x4a4   : > { %1275 = vst.msk [vmem:[#allocation3 + $0x8] sm:$0xff] %vm965_vm9, %v1271_v10 }
 0x4a9   : > { %v1081_v11 = vpop.f32.mrf.mxu2 }
 0x4ab   : > { %v1273_v13 = vpop.f32.mrf.mxu1 }
 0x4b1   : > { %v1207_v14 = vpop.f32.mrf.mxu2 }
 0x4b2   : > { %1212 = vrot.lane.b32.xlu2 %v1207_v14, %s2553_s16 }
 0x4b3   : > { %v1396_v15 = vpop.f32.mrf.mxu1 }
 0x4b4   : > { %1401 = vrot.lane.b32.xlu0 %v1396_v15, %s2551_s29 }
 0x4b9   : > { %v1209_v16 = vpop.f32.mrf.mxu2 }
 0x4bb   : > { %v1398_v63 = vpop.f32.mrf.mxu1 }
 0x4c1   : > { %v1333_v17 = vpop.f32.mrf.mxu2  ;;  %v1149_v12 = vpop.permute.xlu2 %1148 }
 0x4c2   : > { %1338 = vrot.lane.b32.xlu0 %v1333_v17, %s2552_s20  ;;  %s3099_s20 = scalar_lea.vmem %s3059_s9, %s2674_s23 }
 0x4c9   : > { %v1335_v18 = vpop.f32.mrf.mxu2 }
 0x4ca   : > { %v2451_v18 = vld [vmem:[%s3098_s21] ss:$0 sm:$0xff] }
 0x4d1   : > { %v1459_v7 = vpop.f32.mrf.mxu2 }
 0x4d2   : > { %1464 = vrot.lane.b32.xlu0 %v1459_v7, %s2553_s16 }
 0x4d9   : > { %v1461_v19 = vpop.f32.mrf.mxu2 }
 0x50c   : > { %v1213_v21 = vpop.permute.xlu2 %1212 }
 0x514   : > { %v1085_v20 = vpop.permute.xlu1 %1084 }
 0x515   : > { %1088 = vst.msk [vmem:[#allocation3] sm:$0xff] %vm1087_vm12, %v1085_v20  ;;  %v2452_v20 = vld [vmem:[%s3099_s20] ss:$0 sm:$0xff]  ;;  %s3101_s20 = sld [smem:[#allocation17_spill]] (!%p2301_p5) }
 0x516   : > { %1152 = vst.msk [vmem:[#allocation3] sm:$0xff] %vm1151_vm13, %v1149_v12 }
 0x517   : > { %1216 = vst.msk [vmem:[#allocation3] sm:$0xff] %vm1215_vm14, %v1213_v21 }
 0x51e   : > { %v1468_v29 = vld [vmem:[#allocation3] sm:$0xff] }
 0x526   : > { %v1402_v26 = vpop.permute.xlu0 %1401 }
 0x534   : > { %v1339_v27 = vpop.permute.xlu0 %1338 }
 0x535   : > { %1341 = vst.msk [vmem:[#allocation3 + $0x8] sm:$0xff] %vm1087_vm12, %v1339_v27  ;;  %v2401_v27 = vld [vmem:[%s2718_s6 + $0x38] sm:$0xff] }
 0x536   : > { %1404 = vst.msk [vmem:[#allocation3 + $0x8] sm:$0xff] %vm1151_vm13, %v1402_v26  ;;  %1730 = vmatpush.bf16.msra.mxu3 %v2401_v27 }
 0x544   : > { %v1465_v28 = vpop.permute.xlu0 %1464 }
 0x545   : > { %1467 = vst.msk [vmem:[#allocation3 + $0x8] sm:$0xff] %vm1215_vm14, %v1465_v28  ;;  %v2400_v28 = vld [vmem:[%s2718_s6 + $0x30] sm:$0xff] }
 0x546   : > { %1731 = vmatpush.bf16.msra.mxu3 %v2400_v28 }
 0x54c   : > { %v1469_v30 = vld [vmem:[#allocation3 + $0x8] sm:$0xff] }
 0x54d   : > { %v1470_v31 = vpack.c.bf16 %v1469_v30, %v1468_v29  ;;  %v2399_v29 = vld [vmem:[%s2718_s6 + $0x28] sm:$0xff]  ;;  %v2398_v30 = vld [vmem:[%s2718_s6 + $0x20] sm:$0xff] }
 0x54e   : > { %1732 = vmatpush.bf16.msra.mxu3 %v2399_v29  ;;  %v2455_v29 = vld [vmem:[%s787_s28] ss:$0 sm:$0xff] }
 0x54f   : > { %2251 = vmatmul.msk.bf16.vlgmr.msra.gmra.mxu0 %vm921_vm8, %v1470_v31  ;;  %v2397_v31 = vld [vmem:[%s2718_s6 + $0x18] sm:$0xff] }
 0x552   : > { %1733 = vmatpush.bf16.msra.mxu3 %v2398_v30 }
 0x556   : > { %1734 = vmatpush.bf16.msra.mxu3 %v2397_v31  ;;  %v2456_v31 = vld [vmem:[%s790_s4] ss:$0 sm:$0xff]  ;;  %s3100_s4 = sld [smem:[#allocation15_spill]] (!%p2301_p5) }
 0x5cc   : > { %v1519_v33 = vpop.f32.mrf.mxu0 }
 0x5cd   : > { %v1520_v34 = vadd.f32 %v2450_v32, %v1519_v33  ;;  %v2453_v33 = vld [vmem:[%s776_s1] ss:$0 sm:$0xff] }
 0x5cf   : > { %v1524_v35 = vadd.f32 %v1520_v34, %v2759_v61  ;;  %v2917_v61 = vsel %vm1539_vm15, %v2490_v42, %v1538_v45  ;;  %v2395_v34 = vld [vmem:[%s2718_s6 + $0x8] sm:$0xff] }
 0x5d1   : > { %v1528_v36 = vsel %vm921_vm8, %v1524_v35, 0.0 }
 0x5d2   : > { %1529 = vadd.xlane.f32.xlu1 %v1528_v36  ;;  %v2394_v36 = vld [vmem:[%s2718_s6] sm:$0xff] }
 0x5d4   : > { %v1521_v37 = vpop.f32.mrf.mxu0 }
 0x5d5   : > { %v1522_v38 = vadd.f32 %v2450_v32, %v1521_v37  ;;  %v2396_v32 = vld [vmem:[%s2718_s6 + $0x10] sm:$0xff] }
 0x5d6   : > { %1735 = vmatpush.bf16.msra.mxu3 %v2396_v32 }
 0x5d7   : > { %v1525_v39 = vadd.f32 %v1522_v38, %v2761_v62 }
 0x5d9   : > { %v1531_v40 = vsel %vm921_vm8, %v1525_v39, 0.0 }
 0x5da   : > { %1532 = vadd.xlane.f32.xlu2 %v1531_v40  ;;  %1736 = vmatpush.bf16.msra.mxu3 %v2395_v34 }
 0x5de   : > { %1737 = vmatpush.bf16.msra.mxu3 %v2394_v36 }
 0x645   : > { %v1530_v46 = vpop.xlane.xlu1 %1529 }
 0x646   : > { %v1541_v47 = vmul.f32 %v2917_v61, %v1530_v46 }
 0x648   : > { %v1543_v62 = vsub.f32 %v1524_v35, %v1541_v47 }
 0x64a   : > { %v1545_v48 = vmul.f32 %v1543_v62, %v1543_v62 }
 0x64c   : > { %v1547_v49 = vsel %vm921_vm8, %v1545_v48, 0.0 }
 0x64d   : > { %v1533_v50 = vpop.xlane.xlu2 %1532  ;;  %1548 = vadd.xlane.f32.xlu0 %v1547_v49 }
 0x64e   : > { %v1542_v51 = vmul.f32 %v2917_v61, %v1533_v50 }
 0x650   : > { %v1544_v52 = vsub.f32 %v1525_v39, %v1542_v51 }
 0x652   : > { %v1546_v53 = vmul.f32 %v1544_v52, %v1544_v52 }
 0x654   : > { %v1550_v54 = vsel %vm921_vm8, %v1546_v53, 0.0 }
 0x655   : > { %1551 = vadd.xlane.f32.xlu1 %v1550_v54 }
 0x6c0   : > { %v1549_v57 = vpop.xlane.xlu0 %1548 }
 0x6c1   : > { %v1553_v60 = vmul.f32 %v1549_v57, %v2917_v61  ;;  %v2454_v57 = vld [vmem:[%s784_s25] ss:$0 sm:$0xff] }
 0x6c3   : > { %v1555_v2 = vadd.f32 1e-12, %v1553_v60 }
 0x6c5   : > { %2491 = vrsqrt.f32 %v1555_v2  ;;  %vm1563_vm1 = vweird.f32 %v1555_v2 }
 0x6c8   : > { %v1552_v4 = vpop.xlane.xlu1 %1551 }
 0x6c9   : > { %v1554_v5 = vmul.f32 %v1552_v4, %v2917_v61 }
 0x6cb   : > { %v2492_v1 = vpop.eup %2491  ;;  %v1556_v6 = vadd.f32 1e-12, %v1554_v5 }
 0x6cc   : > { %v1558_v8 = vmul.f32 %v2492_v1, %v1555_v2  ;;  %vm1564_vm0 = vweird.f32 %v2492_v1 }
 0x6cd   : > { %2493 = vrsqrt.f32 %v1556_v6  ;;  %vm1565_vm2 = vmor %vm1563_vm1, %vm1564_vm0  ;;  %vm1573_vm4 = vweird.f32 %v1556_v6 }
 0x6ce   : > { %v1559_v9 = vmul.f32 %v2492_v1, %v1558_v8 }
 0x6d0   : > { %v1560_v59 = vmul.f32 0.5, %v1559_v9 }
 0x6d2   : > { %v1561_v10 = vsub.f32 1.5, %v1560_v59 }
 0x6d3   : > { %v2494_v11 = vpop.eup %2493 }
 0x6d4   : > { %v1562_v13 = vmul.f32 %v2492_v1, %v1561_v10  ;;  %v1568_v14 = vmul.f32 %v2494_v11, %v1556_v6  ;;  %vm1574_vm3 = vweird.f32 %v2494_v11 }
 0x6d5   : > { %vm1575_vm5 = vmor %vm1573_vm4, %vm1574_vm3 }
 0x6d6   : > { %v1569_v15 = vmul.f32 %v2494_v11, %v1568_v14  ;;  %v1566_v16 = vsel %vm1565_vm2, %v2492_v1, %v1562_v13 }
 0x6d7   : > { %v1577_v7 = vmul.f32 %v1566_v16, %v1543_v62 }
 0x6d8   : > { %v1570_v63 = vmul.f32 0.5, %v1569_v15 }
 0x6d9   : > { %v1582_v21 = vmul.f32 %v2451_v18, %v1577_v7 }
 0x6da   : > { %v1571_v17 = vsub.f32 1.5, %v1570_v63 }
 0x6db   : > { %v1587_v24 = vadd.f32 %v2452_v20, %v1582_v21 }
 0x6dc   : > { %v1572_v19 = vmul.f32 %v2494_v11, %v1571_v17 }
 0x6de   : > { %v1576_v12 = vsel %vm1575_vm5, %v2494_v11, %v1572_v19 }
 0x6df   : > { %v1578_v22 = vmul.f32 %v1576_v12, %v1544_v52 }
 0x6e1   : > { %v1583_v23 = vmul.f32 %v2451_v18, %v1578_v22 }
 0x6e3   : > { %v1588_v25 = vadd.f32 %v2452_v20, %v1583_v23 }
 0x6e5   : > { %v1589_v26 = vpack.c.bf16 %v1588_v25, %v1587_v24 }
 0x6e7   : > { %2268 = vmatmul.msk.bf16.vlgmr.msra.gmra.mxu1 %vm921_vm8, %v1589_v26 }
 0x764   : > { %v1638_v35 = vpop.f32.mrf.mxu1 }
 0x765   : > { %v1639_v37 = vadd.f32 %v2453_v33, %v1638_v35 }
 0x767   : > { %v1643_v38 = vmul.f32 %v1639_v37, %v1639_v37 }
 0x769   : > { %v1645_v39 = vmul.f32 %v1643_v38, %v1639_v37 }
 0x76b   : > { %v1647_v40 = vmul.f32 0.044715, %v1645_v39 }
 0x76c   : > { %v1640_v41 = vpop.f32.mrf.mxu1 }
 0x76d   : > { %v1649_v42 = vadd.f32 %v1647_v40, %v1639_v37  ;;  %v1641_v0 = vadd.f32 %v2453_v33, %v1640_v41 }
 0x76f   : > { %v1651_v43 = vmul.f32 0.7978846, %v1649_v42  ;;  %v1644_v44 = vmul.f32 %v1641_v0, %v1641_v0 }
 0x771   : > { %v1646_v45 = vmul.f32 %v1644_v44, %v1641_v0  ;;  %2495 = vtanh.f32 %v1651_v43 }
 0x773   : > { %v1648_v46 = vmul.f32 0.044715, %v1646_v45 }
 0x775   : > { %v1650_v47 = vadd.f32 %v1648_v46, %v1641_v0 }
 0x777   : > { %v1652_v62 = vmul.f32 0.7978846, %v1650_v47  ;;  %v2496_v48 = vpop.eup %2495 }
 0x778   : > { %v1655_v49 = vadd.f32 1.0, %v2496_v48 }
 0x779   : > { %2497 = vtanh.f32 %v1652_v62 }
 0x77a   : > { %v1657_v51 = vmul.f32 0.5, %v1655_v49 }
 0x77c   : > { %v1659_v54 = vmul.f32 %v1657_v51, %v1639_v37 }
 0x77f   : > { %v2498_v50 = vpop.eup %2497 }
 0x780   : > { %v1656_v52 = vadd.f32 1.0, %v2498_v50 }
 0x782   : > { %v1658_v53 = vmul.f32 0.5, %v1656_v52 }
 0x784   : > { %v1660_v55 = vmul.f32 %v1658_v53, %v1641_v0 }
 0x786   : > { %v1661_v56 = vpack.c.bf16 %v1660_v55, %v1659_v54 }
 0x788   : > { %1738 = vmatmul.bf16.vlgmr.msra.gmra.mxu3 %v1661_v56 }
 0x80b   : > { %v1739_v58 = vpop.f32.mrf.mxu3 }
 0x80c   : > { %v1740_v60 = vadd.f32 %v2454_v57, %v1739_v58 }
 0x80e   : > { %v1744_v2 = vadd.f32 %v1740_v60, %v1587_v24 }
 0x810   : > { %v1748_v3 = vsel %vm921_vm8, %v1744_v2, 0.0 }
 0x811   : > { %1749 = vadd.xlane.f32.xlu2 %v1748_v3 }
 0x813   : > { %v1741_v4 = vpop.f32.mrf.mxu3 }
 0x814   : > { %v1742_v5 = vadd.f32 %v2454_v57, %v1741_v4 }
 0x816   : > { %v1745_v1 = vadd.f32 %v1742_v5, %v1588_v25 }
 0x818   : > { %v1751_v6 = vsel %vm921_vm8, %v1745_v1, 0.0 }
 0x819   : > { %1752 = vadd.xlane.f32.xlu0 %v1751_v6 }
 0x884   : > { %v1750_v8 = vpop.xlane.xlu2 %1749 }
 0x885   : > { %v1754_v9 = vmul.f32 %v1750_v8, %v2917_v61 }
 0x887   : > { %v1756_v59 = vsub.f32 %v1744_v2, %v1754_v9 }
 0x889   : > { %v1758_v10 = vmul.f32 %v1756_v59, %v1756_v59 }
 0x88b   : > { %v1760_v11 = vsel %vm921_vm8, %v1758_v10, 0.0 }
 0x88c   : > { %v1753_v13 = vpop.xlane.xlu0 %1752  ;;  %1761 = vadd.xlane.f32.xlu1 %v1760_v11 }
 0x88d   : > { %v1755_v14 = vmul.f32 %v1753_v13, %v2917_v61 }
 0x88f   : > { %v1757_v15 = vsub.f32 %v1745_v1, %v1755_v14 }
 0x891   : > { %v1759_v16 = vmul.f32 %v1757_v15, %v1757_v15 }
 0x893   : > { %v1763_v63 = vsel %vm921_vm8, %v1759_v16, 0.0 }
 0x894   : > { %1764 = vadd.xlane.f32.xlu2 %v1763_v63 }
 0x8ff   : > { %v1762_v17 = vpop.xlane.xlu1 %1761 }
 0x900   : > { %v1766_v18 = vmul.f32 %v1762_v17, %v2917_v61 }
 0x902   : > { %v1768_v7 = vadd.f32 1e-12, %v1766_v18 }
 0x904   : > { %2499 = vrsqrt.f32 %v1768_v7  ;;  %vm1776_vm7 = vweird.f32 %v1768_v7 }
 0x907   : > { %v1765_v19 = vpop.xlane.xlu2 %1764 }
 0x908   : > { %v1767_v12 = vmul.f32 %v1765_v19, %v2917_v61 }
 0x90a   : > { %v2500_v20 = vpop.eup %2499  ;;  %v1769_v21 = vadd.f32 1e-12, %v1767_v12 }
 0x90b   : > { %v1771_v22 = vmul.f32 %v2500_v20, %v1768_v7  ;;  %vm1777_vm6 = vweird.f32 %v2500_v20 }
 0x90c   : > { %2501 = vrsqrt.f32 %v1769_v21  ;;  %vm1778_vm9 = vmor %vm1776_vm7, %vm1777_vm6  ;;  %vm1786_vm11 = vweird.f32 %v1769_v21 }
 0x90d   : > { %v1772_v23 = vmul.f32 %v2500_v20, %v1771_v22 }
 0x90f   : > { %v1773_v24 = vmul.f32 0.5, %v1772_v23 }
 0x911   : > { %v1774_v25 = vsub.f32 1.5, %v1773_v24 }
 0x912   : > { %v2502_v26 = vpop.eup %2501 }
 0x913   : > { %v1775_v27 = vmul.f32 %v2500_v20, %v1774_v25  ;;  %v1781_v28 = vmul.f32 %v2502_v26, %v1769_v21  ;;  %vm1787_vm10 = vweird.f32 %v2502_v26 }
 0x914   : > { %vm1788_vm12 = vmor %vm1786_vm11, %vm1787_vm10 }
 0x915   : > { %v1779_v61 = vsel %vm1778_vm9, %v2500_v20, %v1775_v27  ;;  %v1782_v30 = vmul.f32 %v2502_v26, %v1781_v28 }
 0x916   : > { %v1790_v32 = vmul.f32 %v1779_v61, %v1756_v59 }
 0x917   : > { %v1783_v33 = vmul.f32 0.5, %v1782_v30 }
 0x918   : > { %v1795_v34 = vmul.f32 %v2455_v29, %v1790_v32 }
 0x919   : > { %v1784_v35 = vsub.f32 1.5, %v1783_v33 }
 0x91a   : > { %v1800_v36 = vadd.f32 %v2456_v31, %v1795_v34 }
 0x91b   : > { %v1785_v37 = vmul.f32 %v2502_v26, %v1784_v35 }
 0x91c   : > { %1802 = vst.msk [vmem:[#allocation2] sm:$0xff] %vm921_vm8, %v1800_v36 }
 0x91d   : > { %v1789_v38 = vsel %vm1788_vm12, %v2502_v26, %v1785_v37 }
 0x91e   : > { %v1791_v39 = vmul.f32 %v1789_v38, %v1757_v15 }
 0x920   : > { %v1796_v40 = vmul.f32 %v2455_v29, %v1791_v39  ;;  %1807 = sbr.rel (%p2301_p5) target bundleno = 2640 (0xa50), region = 108 }
 0x922   : > { %v1801_v41 = vadd.f32 %v2456_v31, %v1796_v40 }
 0x924   : > { %1803 = vst.msk [vmem:[#allocation2 + $0x8] sm:$0xff] %vm921_vm8, %v1801_v41 }
 0x925   : > { %v2413_v42 = vld [vmem:[%s3100_s4 + $0x18] sm:$0xff]  ;;  %v2412_v43 = vld [vmem:[%s3100_s4 + $0x10] sm:$0xff]  ;;  %v2411_v47 = vld [vmem:[%s3100_s4 + $0x8] sm:$0xff]  ;;  %v1910_v50 = vpack.c.bf16 %v1801_v41, %v1801_v41  ;;  %v1808_v51 = vpack.c.bf16 %v1800_v36, %v1800_v36 }
 0x926   : > { %v2405_v0 = vld [vmem:[%s3100_s4 + $0x18] sm:$0xff]  ;;  %1951 = vmatpush.bf16.msra.mxu2 %v2413_v42  ;;  %v2404_v44 = vld [vmem:[%s3100_s4 + $0x10] sm:$0xff]  ;;  %v2403_v62 = vld [vmem:[%s3100_s4 + $0x8] sm:$0xff] }
 0x927   : > { %1849 = vmatpush.bf16.msra.mxu0 %v2405_v0  ;;  %v2409_v45 = vld [vmem:[%s3101_s20 + $0x18] sm:$0xff]  ;;  %v2410_v48 = vld [vmem:[%s3100_s4] sm:$0xff]  ;;  %v2408_v52 = vld [vmem:[%s3101_s20 + $0x10] sm:$0xff] }
 0x928   : > { %v2417_v46 = vld [vmem:[%s3101_s20 + $0x18] sm:$0xff]  ;;  %1900 = vmatpush.bf16.msra.mxu1 %v2409_v45  ;;  %v2402_v49 = vld [vmem:[%s3100_s4] sm:$0xff]  ;;  %v2416_v53 = vld [vmem:[%s3101_s20 + $0x10] sm:$0xff] }
 0x929   : > { %2002 = vmatpush.bf16.msra.mxu3 %v2417_v46  ;;  %v2407_v54 = vld [vmem:[%s3101_s20 + $0x8] sm:$0xff]  ;;  %v2406_v56 = vld [vmem:[%s3101_s20] sm:$0xff] }
 0x92a   : > { %1952 = vmatpush.bf16.msra.mxu2 %v2412_v43  ;;  %v2415_v55 = vld [vmem:[%s3101_s20 + $0x8] sm:$0xff]  ;;  %v2414_v57 = vld [vmem:[%s3101_s20] sm:$0xff] }
 0x92b   : > { %1850 = vmatpush.bf16.msra.mxu0 %v2404_v44  ;;  %v1817_v58 = vld [vmem:[%s3102_s26] sm:$0x1] }
 0x92c   : > { %1901 = vmatpush.bf16.msra.mxu1 %v2408_v52  ;;  %v1919_v3 = vld [vmem:[%s3102_s26] sm:$0x1] }
 0x92d   : > { %2003 = vmatpush.bf16.msra.mxu3 %v2416_v53  ;;  %v1868_v11 = vld [vmem:[%s3103_s30] sm:$0x1] }
 0x92e   : > { %1953 = vmatpush.bf16.msra.mxu2 %v2411_v47  ;;  %v1970_v16 = vld [vmem:[%s3103_s30] sm:$0x1] }
 0x92f   : > { %1851 = vmatpush.bf16.msra.mxu0 %v2403_v62 }
 0x930   : > { %1902 = vmatpush.bf16.msra.mxu1 %v2407_v54 }
 0x931   : > { %2004 = vmatpush.bf16.msra.mxu3 %v2415_v55 }
 0x932   : > { %1954 = vmatpush.bf16.msra.mxu2 %v2410_v48 }
 0x933   : > { %1852 = vmatpush.bf16.msra.mxu0 %v2402_v49 }
 0x934   : > { %1903 = vmatpush.bf16.msra.mxu1 %v2406_v56 }
 0x935   : > { %2352 = vmatmul.msk.bf16.vlgmr.msra.gmra.mxu2 %vm921_vm8, %v1910_v50  ;;  %2005 = vmatpush.bf16.msra.mxu3 %v2414_v57 }
 0x936   : > { %2318 = vmatmul.msk.bf16.vlgmr.msra.gmra.mxu0 %vm921_vm8, %v1808_v51 }
 0x9b3   : > { %v1854_v60 = vpop.f32.mrf.mxu0 }
 0x9b4   : > { %v1855_v2 = vadd.f32 %v1854_v60, %v1817_v58 }
 0x9b6   : > { %2503 = vtanh.f32 %v1855_v2 }
 0x9b8   : > { %v1956_v4 = vpop.f32.mrf.mxu2 }
 0x9b9   : > { %v1957_v5 = vadd.f32 %v1956_v4, %v1919_v3 }
 0x9bb   : > { %v1856_v1 = vpop.f32.mrf.mxu0  ;;  %2505 = vtanh.f32 %v1957_v5 }
 0x9bc   : > { %v2504_v6 = vpop.eup %2503 }
 0x9bd   : > { %v1859_v8 = vpack.c.bf16 %v2504_v6, %v2504_v6 }
 0x9bf   : > { %2335 = vmatmul.msk.bf16.vlgmr.msra.gmra.mxu1 %vm921_vm8, %v1859_v8 }
 0x9c0   : > { %v1958_v9 = vpop.f32.mrf.mxu2 }
 0x9c1   : > { %v2506_v59 = vpop.eup %2505 }
 0x9c2   : > { %v1961_v10 = vpack.c.bf16 %v2506_v59, %v2506_v59 }
 0x9c4   : > { %2369 = vmatmul.msk.bf16.vlgmr.msra.gmra.mxu3 %vm921_vm8, %v1961_v10 }
 0xa3c   : > { %v1905_v13 = vpop.f32.mrf.mxu1 }
 0xa3d   : > { %v1906_v14 = vadd.f32 %v1905_v13, %v1868_v11 }
 0xa3f   : > { %1909 = vst [vmem:[#allocation4] sm:$0x1] %v1906_v14 }
 0xa44   : > { %v1907_v15 = vpop.f32.mrf.mxu1 }
 0xa47   : > { %v2007_v63 = vpop.f32.mrf.mxu3 }
 0xa48   : > { %v2008_v17 = vadd.f32 %v2007_v63, %v1970_v16 }
 0xa4a   : > { %2011 = vst [vmem:[#allocation4 + $0x1] sm:$0x1] %v2008_v17 }
 0xa4f   : > { %v2009_v18 = vpop.f32.mrf.mxu3 }
 0xa50 PF: > { %p2422_p6 = scmp.eq.s32.totalorder %s2668_s22, 1  ;;  %s2556_s17 = smov [#allocation4]  }
 0xa51   : > { %s2018_s21 = sshll.u32 %s2556_s17, 4  ;;  %s3104_s16 = sld [smem:[#allocation19_spill]]  ;;  %s2019_s21 = int_to_ptr.vmem [resolvable:$true] %s2018_s21 }
 0xa57   : > { %s2020_s18 = sshll.u32 %s3104_s16, 4  ;;  %s2021_s18 = int_to_ptr.hbm [resolvable:$true] %s2020_s18 }
 0xa58   : > { %2419 = dma.vmem_to_hbm [thread:$0]  (%p2422_p6), %s2019_s21, 32, %s2021_s18, [#allocation5]  }
 0xa59   : > { %2540 = dma.done.wait (%p2422_p6), [#allocation5], 32  }
 0xa5a   : > { %2542 = vsyncadd (%p2422_p6), [#allocation5], 4294967264 }
 0xa5b PF: > { %s3105_s6 = sld [smem:[#allocation7_spill]] }
 0xa61   : > { %s31_s1 = sadd.s32 1, %s3105_s6  }
 0xa62   : > { %p28_p7 = scmp.ge.s32.totalorder %s31_s1, 4  }
 0xa64   :  { %30 = sbr.rel (!%p28_p7) target bundleno = 14 (0xe), region = 168 }
 0xa69   :  { %2034 = vsyncpa [#allocation5], 1 }
 0xa6a   :  { %2036 = vsyncpa [#allocation5 + $0x1], 1 }

</bundles_post_ra>
